<compile_context>
chip_gen: v5e
topology: v5e:2x2
jax: 0.10.0
libtpu: 0.0.40
codegen_flags: <defaults>
</compile_context>

<pallas_src>
import functools

import jax
import jax.numpy as jnp
from jax.experimental import pallas as pl
from jax.experimental.pallas import tpu as pltpu

BN_EPS = 1e-5


def _conv_gen_kernel(x_ref, w1_ref, b1_ref, w2_ref, b2_ref, w3_ref, b3_ref, o_ref):
    # x_ref: (C_in, L_TILE)  -- channels on sublanes, spatial on lanes.
    x = x_ref[...].astype(jnp.float32)

    # omega_0 and eval-mode BatchNorm are pre-folded into w/b in the wrapper.
    h = jnp.dot(w1_ref[...], x, preferred_element_type=jnp.float32) + b1_ref[...]
    h = jnp.sin(h)                                              # (H, L_TILE)

    h = jnp.dot(w2_ref[...], h, preferred_element_type=jnp.float32) + b2_ref[...]
    h = jnp.sin(h)                                              # (H, L_TILE)

    out = jnp.dot(w3_ref[...], h, preferred_element_type=jnp.float32) + b3_ref[...]
    o_ref[...] = out.astype(o_ref.dtype)                        # (C_out, L_TILE)


def _weight_norm(v, g):
    """PyTorch weight_norm (dim=0) for a k=1 Conv1d weight v: (out, in), g: (out,)."""
    norm = jnp.sqrt(jnp.sum(v * v, axis=1, keepdims=True))
    return g[:, None] * v / norm


def _fold_params(params, omega_0):
    """Fold omega_0 scaling and eval-mode BatchNorm into the conv weights/biases."""
    w1 = _weight_norm(params["v1"], params["g1"])          # (H, C_in)
    w2 = _weight_norm(params["v2"], params["g2"])          # (H, H)
    w3 = _weight_norm(params["v3"], params["g3"])          # (C_out, H)

    s1 = params["bn1_gamma"] * jax.lax.rsqrt(params["bn1_var"] + BN_EPS)
    s2 = params["bn2_gamma"] * jax.lax.rsqrt(params["bn2_var"] + BN_EPS)

    w1f = (omega_0 * s1)[:, None] * w1
    b1f = s1 * (omega_0 * params["b1"] - params["bn1_mean"]) + params["bn1_beta"]
    w2f = (omega_0 * s2)[:, None] * w2
    b2f = s2 * (omega_0 * params["b2"] - params["bn2_mean"]) + params["bn2_beta"]
    w3f = w3
    b3f = params["b3"]

    col = lambda b: b.reshape(-1, 1).astype(jnp.float32)    # (C, 1) lane-broadcast
    return (w1f.astype(jnp.float32), col(b1f),
            w2f.astype(jnp.float32), col(b2f),
            w3f.astype(jnp.float32), col(b3f))


def _choose_l_tile(L):
    """Prefer lane-dense tiles (multiples of 128) that divide L exactly."""
    for t in (2048, 1024, 512, 256, 128):
        if L % t == 0:
            return t
    return L  # small / irregular L: one block covers the whole spatial axis


@functools.partial(jax.jit, static_argnames=("omega_0",))
def conv_generator_forward(x, params, *, omega_0):
    """x: (B, C_in, L) in PyTorch NCL layout  ->  (B, C_out, L)."""
    B, C_in, L = x.shape
    w1, b1, w2, b2, w3, b3 = _fold_params(params, float(omega_0))
    C_out = w3.shape[0]

    # Pick a lane-dense spatial tile; only pad L for large, 128-irregular L.
    LT = _choose_l_tile(L)
    Lp = L
    xk = x
    if LT == L and L > 4096:
        LT = 512
        Lp = pl.cdiv(L, LT) * LT
        xk = jnp.pad(x, ((0, 0), (0, 0), (0, Lp - L)))

    grid = (B, Lp // LT)

    full = lambda a: pl.BlockSpec(a.shape, lambda b, l: (0, 0))  # resident params
    in_specs = [
        pl.BlockSpec((None, C_in, LT), lambda b, l: (b, 0, l)),  # x block (C_in, LT)
        full(w1), full(b1), full(w2), full(b2), full(w3), full(b3),
    ]
    out_specs = pl.BlockSpec((None, C_out, LT), lambda b, l: (b, 0, l))

    out = pl.pallas_call(
        _conv_gen_kernel,
        out_shape=jax.ShapeDtypeStruct((B, C_out, Lp), x.dtype),
        grid_spec=pltpu.PrefetchScalarGridSpec(
            num_scalar_prefetch=0,
            grid=grid,
            in_specs=in_specs,
            out_specs=out_specs,
        ),
        compiler_params=pltpu.CompilerParams(
            dimension_semantics=("parallel", "parallel"),
        ),
    )(xk, w1, b1, w2, b2, w3, b3)

    if Lp != L:
        out = out[:, :, :L]
    return out


def _reference_forward(x, p, omega_0):
    """Pure-JAX eval-mode reference (high-precision dots) for validation."""
    w1 = _weight_norm(p["v1"], p["g1"])
    w2 = _weight_norm(p["v2"], p["g2"])
    w3 = _weight_norm(p["v3"], p["g3"])
    hp = jax.lax.Precision.HIGHEST

    def conv(w, b, h):
        return jnp.einsum("oi,bil->bol", w, h, precision=hp) + b[None, :, None]

    def bn(h, g, be, m, v):
        inv = jax.lax.rsqrt(v + BN_EPS)
        return (h - m[None, :, None]) * (g * inv)[None, :, None] + be[None, :, None]

    h = jnp.sin(bn(omega_0 * conv(w1, p["b1"], x),
                   p["bn1_gamma"], p["bn1_beta"], p["bn1_mean"], p["bn1_var"]))
    h = jnp.sin(bn(omega_0 * conv(w2, p["b2"], h),
                   p["bn2_gamma"], p["bn2_beta"], p["bn2_mean"], p["bn2_var"]))
    return conv(w3, p["b3"], h)


def init_params(key, input_channels, output_channels, hidden_dim):
    ks = jax.random.split(key, 12)
    H = hidden_dim
    p = {}
    # weight_norm'd Conv1d(kernel_size=1) params: v (out, in), g (out,), b (out,)
    p["v1"] = jax.random.normal(ks[0], (H, input_channels), jnp.float32) * 0.3
    p["g1"] = jax.random.uniform(ks[1], (H,), jnp.float32, 0.5, 1.5)
    p["b1"] = jax.random.normal(ks[2], (H,), jnp.float32) * 0.1
    p["v2"] = jax.random.normal(ks[3], (H, H), jnp.float32) * 0.3
    p["g2"] = jax.random.uniform(ks[4], (H,), jnp.float32, 0.5, 1.5)
    p["b2"] = jax.random.normal(ks[5], (H,), jnp.float32) * 0.1
    p["v3"] = jax.random.normal(ks[6], (output_channels, H), jnp.float32) * 0.3
    p["g3"] = jax.random.uniform(ks[7], (output_channels,), jnp.float32, 0.5, 1.5)
    p["b3"] = jax.random.normal(ks[8], (output_channels,), jnp.float32) * 0.1
    # BatchNorm1d params + running stats (eval mode).
    p["bn1_gamma"] = jnp.ones((H,), jnp.float32)
    p["bn1_beta"] = jnp.zeros((H,), jnp.float32)
    p["bn1_mean"] = jax.random.normal(ks[9], (H,), jnp.float32) * 0.05
    p["bn1_var"] = jnp.ones((H,), jnp.float32) + jax.random.uniform(ks[10], (H,), jnp.float32) * 0.1
    p["bn2_gamma"] = jnp.ones((H,), jnp.float32)
    p["bn2_beta"] = jnp.zeros((H,), jnp.float32)
    p["bn2_mean"] = jax.random.normal(ks[11], (H,), jnp.float32) * 0.05
    p["bn2_var"] = jnp.ones((H,), jnp.float32)
    return p


if __name__ == "__main__":
    B, C_in, C_out, H, L = 2, 4, 4, 32, 16
    omega_0 = 30.0

    key = jax.random.PRNGKey(0)
    k_x, k_p = jax.random.split(key)
    x = jax.random.normal(k_x, (B, C_in, L), jnp.float32)   # PyTorch NCL layout
    params = init_params(k_p, C_in, C_out, H)

    out = conv_generator_forward(x, params, omega_0=omega_0)
    out = jax.block_until_ready(out)

    assert out.shape == (B, C_out, L), out.shape
    assert bool(jnp.all(jnp.isfinite(out)))

    ref = _reference_forward(x, params, omega_0)
    assert bool(jnp.allclose(out, ref, atol=1e-2, rtol=1e-2)), (
        float(jnp.max(jnp.abs(out - ref)))
    )
    print("KERNEL_OK")
</pallas_src>

<mosaic_0001>
module attributes {stable_mosaic.version = 11 : i64} {
  func.func @_conv_gen_kernel(%arg0: i32, %arg1: i32, %arg2: memref<1x4x16xf32, #tpu.memory_space<vmem>>, %arg3: memref<32x4xf32, #tpu.memory_space<vmem>>, %arg4: memref<32x1xf32, #tpu.memory_space<vmem>>, %arg5: memref<32x32xf32, #tpu.memory_space<vmem>>, %arg6: memref<32x1xf32, #tpu.memory_space<vmem>>, %arg7: memref<4x32xf32, #tpu.memory_space<vmem>>, %arg8: memref<4x1xf32, #tpu.memory_space<vmem>>, %arg9: memref<1x4x16xf32, #tpu.memory_space<vmem>>) attributes {dimension_semantics = [#tpu.dimension_semantics<parallel>, #tpu.dimension_semantics<parallel>], iteration_bounds = array<i64: 2, 1>, scalar_prefetch = 0 : i64, scratch_operands = 0 : i64, tpu.core_type = #tpu.core_type<tc>, window_params = [{transform_indices = @transform_0, window_bounds = array<i64: 1, 4, 16>}, {pipeline_mode = #tpu.pipeline_mode<synchronous>, transform_indices = @transform_1, window_bounds = array<i64: 32, 4>}, {pipeline_mode = #tpu.pipeline_mode<synchronous>, transform_indices = @transform_2, window_bounds = array<i64: 32, 1>}, {pipeline_mode = #tpu.pipeline_mode<synchronous>, transform_indices = @transform_3, window_bounds = array<i64: 32, 32>}, {pipeline_mode = #tpu.pipeline_mode<synchronous>, transform_indices = @transform_4, window_bounds = array<i64: 32, 1>}, {pipeline_mode = #tpu.pipeline_mode<synchronous>, transform_indices = @transform_5, window_bounds = array<i64: 4, 32>}, {pipeline_mode = #tpu.pipeline_mode<synchronous>, transform_indices = @transform_6, window_bounds = array<i64: 4, 1>}, {transform_indices = @transform_7, window_bounds = array<i64: 1, 4, 16>}]} {
    %c0 = arith.constant 0 : index
    %c0_0 = arith.constant 0 : index
    %c0_1 = arith.constant 0 : index
    %0 = vector.load %arg2[%c0, %c0_0, %c0_1] : memref<1x4x16xf32, #tpu.memory_space<vmem>>, vector<1x4x16xf32>
    %1 = vector.shape_cast %0 : vector<1x4x16xf32> to vector<4x16xf32>
    %c0_2 = arith.constant 0 : index
    %c0_3 = arith.constant 0 : index
    %2 = vector.load %arg3[%c0_2, %c0_3] : memref<32x4xf32, #tpu.memory_space<vmem>>, vector<32x4xf32>
    %cst = arith.constant dense<0.000000e+00> : vector<32x16xf32>
    %3 = tpu.matmul %2, %1, %cst {dimension_numbers = #tpu.dot_dimension_numbers<[1], [0], [0], [1], [0, 0, 1, 1], [], []>} : vector<32x4xf32>, vector<4x16xf32>, vector<32x16xf32> -> vector<32x16xf32>
    %c0_4 = arith.constant 0 : index
    %c0_5 = arith.constant 0 : index
    %4 = vector.load %arg4[%c0_4, %c0_5] : memref<32x1xf32, #tpu.memory_space<vmem>>, vector<32x1xf32>
    %5 = vector.broadcast %4 : vector<32x1xf32> to vector<32x16xf32>
    %6 = arith.addf %3, %5 : vector<32x16xf32>
    %7 = math.sin %6 : vector<32x16xf32>
    %c0_6 = arith.constant 0 : index
    %c0_7 = arith.constant 0 : index
    %8 = vector.load %arg5[%c0_6, %c0_7] : memref<32x32xf32, #tpu.memory_space<vmem>>, vector<32x32xf32>
    %cst_8 = arith.constant dense<0.000000e+00> : vector<32x16xf32>
    %9 = tpu.matmul %8, %7, %cst_8 {dimension_numbers = #tpu.dot_dimension_numbers<[1], [0], [0], [1], [0, 0, 1, 1], [], []>} : vector<32x32xf32>, vector<32x16xf32>, vector<32x16xf32> -> vector<32x16xf32>
    %c0_9 = arith.constant 0 : index
    %c0_10 = arith.constant 0 : index
    %10 = vector.load %arg6[%c0_9, %c0_10] : memref<32x1xf32, #tpu.memory_space<vmem>>, vector<32x1xf32>
    %11 = vector.broadcast %10 : vector<32x1xf32> to vector<32x16xf32>
    %12 = arith.addf %9, %11 : vector<32x16xf32>
    %13 = math.sin %12 : vector<32x16xf32>
    %c0_11 = arith.constant 0 : index
    %c0_12 = arith.constant 0 : index
    %14 = vector.load %arg7[%c0_11, %c0_12] : memref<4x32xf32, #tpu.memory_space<vmem>>, vector<4x32xf32>
    %cst_13 = arith.constant dense<0.000000e+00> : vector<4x16xf32>
    %15 = tpu.matmul %14, %13, %cst_13 {dimension_numbers = #tpu.dot_dimension_numbers<[1], [0], [0], [1], [0, 0, 1, 1], [], []>} : vector<4x32xf32>, vector<32x16xf32>, vector<4x16xf32> -> vector<4x16xf32>
    %c0_14 = arith.constant 0 : index
    %c0_15 = arith.constant 0 : index
    %16 = vector.load %arg8[%c0_14, %c0_15] : memref<4x1xf32, #tpu.memory_space<vmem>>, vector<4x1xf32>
    %17 = vector.broadcast %16 : vector<4x1xf32> to vector<4x16xf32>
    %18 = arith.addf %15, %17 : vector<4x16xf32>
    %c0_16 = arith.constant 0 : index
    %c0_17 = arith.constant 0 : index
    %c0_18 = arith.constant 0 : index
    %19 = vector.load %arg9[%c0_16, %c0_17, %c0_18] : memref<1x4x16xf32, #tpu.memory_space<vmem>>, vector<1x4x16xf32>
    %20 = vector.shape_cast %19 : vector<1x4x16xf32> to vector<4x16xf32>
    %21 = vector.shape_cast %18 : vector<4x16xf32> to vector<1x4x16xf32>
    tpu.vector_store %arg9[%c0_16, %c0_17, %c0_18], %21 {strides = array<i32>} : memref<1x4x16xf32, #tpu.memory_space<vmem>>, vector<1x4x16xf32>,
    return
  }
  func.func @transform_0(%arg0: i32, %arg1: i32) -> (i32, i32, i32) {
    %c0_i32 = arith.constant 0 : i32
    %c0_i32_0 = arith.constant 0 : i32
    return %arg0, %c0_i32, %arg1 : i32, i32, i32
  }
  func.func @transform_1(%arg0: i32, %arg1: i32) -> (i32, i32) {
    %c0_i32 = arith.constant 0 : i32
    %c0_i32_0 = arith.constant 0 : i32
    %c0_i32_1 = arith.constant 0 : i32
    return %c0_i32, %c0_i32_0 : i32, i32
  }
  func.func @transform_2(%arg0: i32, %arg1: i32) -> (i32, i32) {
    %c0_i32 = arith.constant 0 : i32
    %c0_i32_0 = arith.constant 0 : i32
    %c0_i32_1 = arith.constant 0 : i32
    return %c0_i32, %c0_i32_0 : i32, i32
  }
  func.func @transform_3(%arg0: i32, %arg1: i32) -> (i32, i32) {
    %c0_i32 = arith.constant 0 : i32
    %c0_i32_0 = arith.constant 0 : i32
    %c0_i32_1 = arith.constant 0 : i32
    return %c0_i32, %c0_i32_0 : i32, i32
  }
  func.func @transform_4(%arg0: i32, %arg1: i32) -> (i32, i32) {
    %c0_i32 = arith.constant 0 : i32
    %c0_i32_0 = arith.constant 0 : i32
    %c0_i32_1 = arith.constant 0 : i32
    return %c0_i32, %c0_i32_0 : i32, i32
  }
  func.func @transform_5(%arg0: i32, %arg1: i32) -> (i32, i32) {
    %c0_i32 = arith.constant 0 : i32
    %c0_i32_0 = arith.constant 0 : i32
    %c0_i32_1 = arith.constant 0 : i32
    return %c0_i32, %c0_i32_0 : i32, i32
  }
  func.func @transform_6(%arg0: i32, %arg1: i32) -> (i32, i32) {
    %c0_i32 = arith.constant 0 : i32
    %c0_i32_0 = arith.constant 0 : i32
    %c0_i32_1 = arith.constant 0 : i32
    return %c0_i32, %c0_i32_0 : i32, i32
  }
  func.func @transform_7(%arg0: i32, %arg1: i32) -> (i32, i32, i32) {
    %c0_i32 = arith.constant 0 : i32
    %c0_i32_0 = arith.constant 0 : i32
    return %arg0, %c0_i32, %arg1 : i32, i32, i32
  }
}

</mosaic_0001>

<bundles_post_ra>
// kernel: conv_generator_forward.1
= control target key start
LH: loop header
LB: loop body
LE: loop exit
PB: predicated region body
PF: predicated region fallthrough
CT: control target
= control target key end

     0   :  { %12 = vsyncpa [#allocation3], 0  ;;  %s3101_s0 = inlined_call_operand.vmem [shape: f32[2,4,16], index: 0, kind: input, shape index: {}]   ;;  %s3102_s1 = inlined_call_operand.vmem [shape: f32[32,4], index: 1, kind: input, shape index: {}]   ;;  %s3103_s2 = inlined_call_operand.vmem [shape: f32[32,1], index: 2, kind: input, shape index: {}]   ;;  %s3104_s3 = inlined_call_operand.vmem [shape: f32[32,32], index: 3, kind: input, shape index: {}]   ;;  %s3105_s4 = inlined_call_operand.vmem [shape: f32[32,1], index: 4, kind: input, shape index: {}]   ;;  %s3106_s5 = inlined_call_operand.vmem [shape: f32[4,32], index: 5, kind: input, shape index: {}]   ;;  %s3107_s6 = inlined_call_operand.vmem [shape: f32[4,1], index: 6, kind: input, shape index: {}]   ;;  %s3108_s7 = inlined_call_operand.hbm [shape: f32[2,4,16], index: 7, kind: output, shape index: {}]  }
   0x1   :  { %14 = vsyncpa [#allocation3 + $0x1], 0  ;;  %s2046_s24 = smov 0   ;;  %s2048_s25 = smov 0  }
   0x2   :  { %s2050_s26 = smov 0   ;;  %s2052_s27 = smov 0  }
   0x3   :  { %s2054_s28 = smov 0   ;;  %s2056_s29 = smov 0  }
   0x4 LB: > { %s1804_s30 = sadd.s32 4294967295, %s1997_s29   ;;  %s1805_s8 = sadd.s32 4294967294, %s1997_s29   ;;  %s1997_s29 = sphi %s2056_s29, %s20_s29   ;;  %s1993_s28 = sphi %s2054_s28, %s3129_s28   ;;  %s1989_s27 = sphi %s2052_s27, %s3128_s27   ;;  %s1985_s26 = sphi %s2050_s26, %s3127_s26   ;;  %s1981_s25 = sphi %s2048_s25, %s3126_s25   ;;  %s1977_s24 = sphi %s2046_s24, %s3125_s24  }
   0x5   : > { %s32_s9 = sadd.s32 1, %s1993_s28  ;;  %s195_s10 = sadd.s32 1, %s1985_s26 }
   0x6   : > { %p34_p0 = scmp.ge.s32.totalorder %s32_s9, 2  ;;  %p205_p1 = scmp.ne.s32.totalorder %s1985_s26, %s1981_s25 }
   0x7   : > { %p206_p2 = scmp.eq.s32.totalorder %s1804_s30, 1  ;;  %p211_p3 = scmp.ne.s32.totalorder %s1981_s25, %s1977_s24 }
   0x8   : > { %s3131_s9 = smov (%p34_p0, %s32_s9), 0  ;;  %p212_p5 = scmp.eq.s32.totalorder %s1805_s8, 1 }
   0x9   : > { %p2086_p4 = por %p206_p2, %p205_p1  ;;  %s190_s12 = ssub.s32 %s1993_s28, %s3131_s9 }
   0xa   : > { %p1808_p6 = scmp.ge.s32.totalorder %s1997_s29, 1  ;;  %p193_p7 = scmp.eq.s32.totalorder %s190_s12, 0 }
   0xb   : > { %p2093_p8 = por %p212_p5, %p211_p3  ;;  %p258_p9 = scmp.lt.s32.totalorder %s1997_s29, 3 }
   0xc   : > { %s2099_s14 = scalar_select %p193_p7, %s1985_s26, %s195_s10  }
   0xd   : > { %p259_p10 = pnand %p1808_p6, %p258_p9 }
   0xe   : > { %p292_p11 = scmp.lt.s32.totalorder (!%p259_p10), %s1989_s27, 1  ;;  %s289_s17 = sand.u32 (!%p259_p10), 1, %s1981_s25  }
   0xf   : > { %262 = sbr.rel (%p259_p10) target bundleno = 815 (0x32f), region = 48  ;;  %s1809_s18 = sshll.u32 (!%p259_p10), %s289_s17, 2 }
  0x10   : > { %s1717_s10 = scalar_lea.sflag (!%p259_p10), [#allocation3], %s289_s17 }
  0x14   : > { %v1999_v0 = vmov 0   ;;  %v307_v1 = vld [vmem:[%s3103_s2 + $0x18] sm:$0xff]  ;;  %v305_v2 = vld [vmem:[%s3103_s2 + $0x8] sm:$0xff]  ;;  %s293_s19 = scalar_select %p292_p11, %s1989_s27, 1  ;;  %vm341_vm0 = vcmask 1043456   ;;  %v300_v3 = vld [vmem:[%s3102_s1] sm:$0xff] }
  0x15   : > { %1917 = vset.pattern.permute.xlu1 %v1999_v0  ;;  %1916 = vset.pattern.permute.xlu0 %v1999_v0  ;;  %vm328_vm1 = vcmask 31744   ;;  %v303_v4 = vld [vmem:[%s3102_s1 + $0x18] sm:$0xff]  ;;  %v306_v6 = vld [vmem:[%s3103_s2 + $0x10] sm:$0xff]  ;;  %v304_v7 = vld [vmem:[%s3103_s2] sm:$0xff]  ;;  %v2000_v46 = vmov 2102212464  }
  0x16   : > { %325 = vperm.xlu0 %1916, %v307_v1   ;;  %315 = vperm.xlu1 %1917, %v305_v2   ;;  %s1810_s20 = sshll.u32 %s293_s19, 2  ;;  %v301_v8 = vld [vmem:[%s3102_s1 + $0x8] sm:$0xff]  ;;  %v998_v10 = vld [vmem:[%s3105_s4] sm:$0xff]  ;;  %v302_v11 = vld [vmem:[%s3102_s1 + $0x10] sm:$0xff]  ;;  %v2001_v48 = vmov 920167782  }
  0x17   : > { %1918 = vset.pattern.permute.xlu2 %v1999_v0  ;;  %s298_s23 = scalar_lea.vmem %s3101_s0, %s1810_s20  ;;  %v999_v9 = vld [vmem:[%s3105_s4 + $0x8] sm:$0xff]  ;;  %v2002_v53 = vmov 1326507024   ;;  %v2003_v57 = vmov 683565275   ;;  %s1846_s19 = sshll.u32 %s1989_s27, 2 }
  0x18   : > { %v299_v5 = vld [vmem:[%s298_s23] sm:$0xf]  ;;  %v2004_v59 = vmov 2475754826   ;;  %s1728_s22 = scalar_lea.hbm %s3108_s7, %s1846_s19  ;;  %s291_s23 = scalar_lea.vmem [#allocation2], %s1809_s18 }
  0x19   : > { %1811 = vmatpush.msk.msra.mxu0 %vm341_vm0, %v299_v5  ;;  %1849 = vmatpush.msk.msra.mxu2 %vm341_vm0, %v299_v5  ;;  %v2005_v5 = vmov 2131351028   ;;  %s1730_s30 = sshll.u32 %s291_s23, 4  ;;  %s1732_s8 = sshll.u32 %s1728_s22, 4  ;;  %s1731_s30 = int_to_ptr.vmem [resolvable:$true] %s1730_s30  ;;  %s1733_s8 = int_to_ptr.hbm [resolvable:$true] %s1732_s8 }
  0x1a   : > { %1812 = vmatmul.msk.f32.vlgmr.msra.gmra.mxu0 %vm328_vm1, %v300_v3  ;;  %1815 = vmatmul.msk.f32.vlgmr.msra.gmra.mxu2 %vm328_vm1, %v303_v4  ;;  %s1933_s12 = sshra.s32 %s1733_s8, 4  ;;  %s1939_s18 = scalar_lea.hbm %s3108_s7, 8  ;;  %s1934_s12 = int_to_ptr.hbm [resolvable:$true] %s1933_s12 }
  0x1b   : > { %s1935_s15 = scalar_lea.hbm %s1934_s12, 4  ;;  %p1940_p1 = scmp.lt.s32.totalorder %s1934_s12, %s3108_s7 }
  0x1c   : > { %p1936_p12 = scmp.ne.s32.totalorder %s1934_s12, %s1935_s15  ;;  %p1941_p2 = scmp.lt.s32.totalorder %s1939_s18, %s1935_s15 }
  0x1e   : > { %320 = vperm.xlu0 %1916, %v306_v6   ;;  %310 = vperm.xlu1 %1917, %v304_v7   ;;  %p1937_p13 = pnand %p1936_p12, %p2086_p4  ;;  %p1942_p3 = por %p1941_p2, %p1940_p1 }
  0x20   : > { %p1938_p0 = pneg %p1937_p13 }
  0x22   : > { %1813 = vmatmul.msk.f32.gmra.mxu0 %vm328_vm1, %v301_v8  ;;  %p1943_p5 = pnand %p1942_p3, %p1938_p0 }
  0x26   : > { %1009 = vperm.xlu0 %1916, %v999_v9   ;;  %1004 = vperm.xlu1 %1917, %v998_v10  }
  0x2a   : > { %1814 = vmatmul.msk.f32.gmra.mxu0 %vm328_vm1, %v302_v11 }
  0x88   : > { %v316_v12 = vpop.permute.xlu1 %315  ;;  %v326_v18 = vpop.permute.xlu0 %325 }
  0x90   : > { %v311_v13 = vpop.permute.xlu1 %310  ;;  %v321_v31 = vpop.permute.xlu0 %320 }
  0x97   : > { %v362_v14 = vpop.f32.mrf.mxu0 }
  0x98   : > { %v2143_v15 = vadd.f32 %v362_v14, %v311_v13 }
  0x9a   : > { %v377_v16 = vand.u32 2139095040, %v2143_v15 }
  0x9c   : > { %v378_v17 = vshrl.u32 %v377_v16, 23 }
  0x9d   : > { %v371_v19 = vpop.f32.mrf.mxu2 }
  0x9e   : > { %v1816_v20 = vadd.s32 4294967169, %v378_v17  ;;  %v2146_v21 = vadd.f32 %v371_v19, %v326_v18 }
  0x9f   : > { %v365_v22 = vpop.f32.mrf.mxu0 }
  0xa0   : > { %v842_v23 = vand.u32 2139095040, %v2146_v21  ;;  %v2149_v24 = vadd.f32 %v365_v22, %v316_v12  ;;  %v384_v25 = vadd.s32 1, %v1816_v20  ;;  %v839_v28 = vand.u32 2147483647, %v2146_v21 }
  0xa2   : > { %v843_v26 = vshrl.u32 %v842_v23, 23  ;;  %v532_v27 = vand.u32 2139095040, %v2149_v24  ;;  %vm385_vm2 = vcmp.gt.s32.totalorder %v384_v25, 0  ;;  %v846_v34 = vand.u32 8388607, %v839_v28 }
  0xa3   : > { %v386_v37 = vsel %vm385_vm2, %v384_v25, 0 }
  0xa4   : > { %v1825_v29 = vadd.s32 4294967169, %v843_v26  ;;  %v533_v30 = vshrl.u32 %v532_v27, 23  ;;  %v847_v41 = vor.u32 8388608, %v846_v34  ;;  %v2158_v42 = vand.u32 31, %v386_v37 }
  0xa5   : > { %v2162_v51 = vshrl.u32 %v386_v37, 5 }
  0xa6   : > { %v849_v32 = vadd.s32 1, %v1825_v29  ;;  %v1819_v35 = vadd.s32 4294967169, %v533_v30  ;;  %v2166_v55 = vshll.u32 %v847_v41, 8  ;;  %v2169_v56 = vsub.s32 32, %v2158_v42 }
  0xa7   : > { %v368_v33 = vpop.f32.mrf.mxu0  ;;  %v2175_v61 = vshll.u32 %v2000_v46, %v2158_v42  ;;  %v2179_v62 = vshll.u32 %v2001_v48, %v2158_v42 }
  0xa8   : > { %v2155_v36 = vadd.f32 %v368_v33, %v321_v31  ;;  %vm850_vm3 = vcmp.gt.s32.totalorder %v849_v32, 0  ;;  %v539_v43 = vadd.s32 1, %v1819_v35  ;;  %v888_v8 = vand.u32 65535, %v2166_v55 }
  0xa9   : > { %v851_v38 = vsel %vm850_vm3, %v849_v32, 0  ;;  %v889_v9 = vshrl.u32 %v2166_v55, 16 }
  0xaa   : > { %v687_v39 = vand.u32 2139095040, %v2155_v36  ;;  %v853_v40 = vand.u32 31, %v851_v38  ;;  %vm540_vm4 = vcmp.gt.s32.totalorder %v539_v43, 0  ;;  %v852_v63 = vshrl.u32 %v851_v38, 5 }
  0xab   : > { %v541_v7 = vsel %vm540_vm4, %v539_v43, 0  ;;  %v684_v17 = vand.u32 2147483647, %v2155_v36 }
  0xac   : > { %v688_v44 = vshrl.u32 %v687_v39, 23  ;;  %v854_v45 = vsub.s32 32, %v853_v40  ;;  %v865_v47 = vshll.u32 %v2000_v46, %v853_v40  ;;  %v868_v49 = vshll.u32 %v2001_v48, %v853_v40 }
  0xad   : > { %v856_v58 = vshll.u32 %v2003_v57, %v853_v40  ;;  %v859_v4 = vshll.u32 %v2004_v59, %v853_v40  ;;  %v862_v13 = vshll.u32 %v2005_v5, %v853_v40  ;;  %vm874_vm6 = vcmp.lt.s32.totalorder %v852_v63, 4 }
  0xae   : > { %v1822_v50 = vadd.s32 4294967169, %v688_v44  ;;  %v866_v52 = vshrl.u32 %v2001_v48, %v854_v45  ;;  %v869_v54 = vshrl.u32 %v2002_v53, %v854_v45  ;;  %v857_v60 = vshrl.u32 %v2004_v59, %v854_v45 }
  0xaf   : > { %v860_v6 = vshrl.u32 %v2005_v5, %v854_v45  ;;  %v863_v16 = vshrl.u32 %v2000_v46, %v854_v45  ;;  %v2192_v20 = vand.u32 31, %v541_v7  ;;  %v855_v22 = vshrl.u32 %v2003_v57, %v854_v45 }
  0xb0   : > { %v694_v1 = vadd.s32 1, %v1822_v50  ;;  %v867_v2 = vor.u32 %v866_v52, %v865_v47  ;;  %v870_v3 = vor.u32 %v869_v54, %v868_v49  ;;  %v858_v11 = vor.u32 %v857_v60, %v856_v58 }
  0xb1   : > { %v861_v12 = vor.u32 %v860_v6, %v859_v4  ;;  %vm871_vm7 = vcmp.lt.s32.totalorder %v852_v63, 1  ;;  %vm872_vm8 = vcmp.lt.s32.totalorder %v852_v63, 2  ;;  %v864_v27 = vor.u32 %v863_v16, %v862_v13 }
  0xb2   : > { %vm695_vm5 = vcmp.gt.s32.totalorder %v694_v1, 0  ;;  %v880_v18 = vsel %vm874_vm6, %v867_v2, 920167782  ;;  %v884_v19 = vsel %vm874_vm6, %v870_v3, 1326507024  ;;  %vm873_vm9 = vcmp.lt.s32.totalorder %v852_v63, 3 }
  0xb3   : > { %v696_v10 = vsel %vm695_vm5, %v694_v1, 0  ;;  %v879_v29 = vsel %vm871_vm7, %v858_v11, %v861_v12  ;;  %v885_v33 = vsel %vm873_vm9, %v867_v2, %v884_v19  ;;  %v875_v34 = vsel %vm871_vm7, %v855_v22, %v858_v11 }
  0xb4   : > { %v2186_v14 = vand.u32 31, %v696_v10  ;;  %v2195_v23 = vshrl.u32 %v696_v10, 5  ;;  %v876_v35 = vsel %vm874_vm6, %v864_v27, 2102212464  ;;  %v881_v37 = vsel %vm873_vm9, %v864_v27, %v880_v18 }
  0xb5   : > { %v883_v38 = vsel %vm871_vm7, %v861_v12, %v864_v27  ;;  %v877_v41 = vsel %vm873_vm9, %v861_v12, %v876_v35  ;;  %v882_v43 = vsel %vm872_vm8, %v879_v29, %v881_v37  ;;  %v2212_v44 = vshrl.u32 %v541_v7, 5 }
  0xb6   : > { %v2198_v25 = vsub.s32 32, %v2186_v14  ;;  %v710_v26 = vshll.u32 %v2000_v46, %v2186_v14  ;;  %v713_v31 = vshll.u32 %v2001_v48, %v2186_v14  ;;  %v886_v45 = vsel %vm872_vm8, %v883_v38, %v885_v33 }
  0xb7   : > { %v912_v47 = vand.u32 65535, %v882_v43  ;;  %v913_v49 = vshrl.u32 %v882_v43, 16  ;;  %v2216_v50 = vsub.s32 32, %v2192_v20  ;;  %vm719_vm10 = vcmp.lt.s32.totalorder %v2195_v23, 4 }
  0xb8   : > { %v711_v30 = vshrl.u32 %v2001_v48, %v2198_v25  ;;  %v714_v32 = vshrl.u32 %v2002_v53, %v2198_v25  ;;  %v890_v52 = vand.u32 65535, %v886_v45  ;;  %v891_v54 = vshrl.u32 %v886_v45, 16 }
  0xb9   : > { %v2220_v58 = vsel %vm872_vm8, %v875_v34, %v877_v41  ;;  %v915_v60 = vmul.u32 %v913_v49, %v888_v8  ;;  %v916_v1 = vmul.u32 %v912_v47, %v889_v9  ;;  %v691_v2 = vand.u32 8388607, %v684_v17 }
  0xba   : > { %v2209_v39 = vor.u32 %v711_v30, %v710_v26  ;;  %v715_v40 = vor.u32 %v714_v32, %v713_v31  ;;  %v893_v6 = vmul.u32 %v891_v54, %v888_v8  ;;  %v894_v7 = vmul.u32 %v890_v52, %v889_v9 }
  0xbb   : > { %v892_v10 = vmul.u32 %v890_v52, %v888_v8  ;;  %v914_v11 = vmul.u32 %v912_v47, %v888_v8  ;;  %v917_v12 = vmul.u32 %v913_v49, %v889_v9  ;;  %v918_v63 = vshll.u32 %v915_v60, 16 }
  0xbc   : > { %v725_v3 = vsel %vm719_vm10, %v2209_v39, 920167782  ;;  %v729_v4 = vsel %vm719_vm10, %v715_v40, 1326507024  ;;  %v895_v13 = vmul.u32 %v891_v54, %v889_v9  ;;  %v896_v16 = vshll.u32 %v893_v6, 16 }
  0xbd   : > { %v919_v18 = vshrl.u32 %v915_v60, 16  ;;  %v920_v19 = vshll.u32 %v916_v1, 16  ;;  %v897_v22 = vshrl.u32 %v893_v6, 16  ;;  %v921_v26 = vshrl.u32 %v916_v1, 16 }
  0xbe   : > { %vm922_vm11 = vc.u32 %v914_v11, %v918_v63  ;;  %v924_v27 = vadd.s32 %v918_v63, %v914_v11  ;;  %v898_v29 = vshll.u32 %v894_v7, 16  ;;  %vm900_vm12 = vc.u32 %v892_v10, %v896_v16 }
  0xbf   : > { %v902_v30 = vadd.s32 %v896_v16, %v892_v10  ;;  %v923_v31 = vsel %vm922_vm11, 1, %v1999_v0  ;;  %v901_v32 = vsel %vm900_vm12, 1, %v1999_v0  ;;  %v692_v8 = vor.u32 8388608, %v691_v2 }
  0xc0   : > { %v925_v33 = vadd.s32 %v923_v31, %v917_v12  ;;  %vm926_vm13 = vc.u32 %v924_v27, %v920_v19  ;;  %v903_v34 = vadd.s32 %v901_v32, %v895_v13  ;;  %v701_v35 = vshll.u32 %v2003_v57, %v2186_v14 }
  0xc1   : > { %vm904_vm14 = vc.u32 %v902_v30, %v898_v29  ;;  %v927_v9 = vsel %vm926_vm13, 1, %v1999_v0  ;;  %v702_v40 = vshrl.u32 %v2004_v59, %v2198_v25  ;;  %v704_v41 = vshll.u32 %v2004_v59, %v2186_v14 }
  0xc2   : > { %v905_v37 = vsel %vm904_vm14, 1, %v1999_v0  ;;  %v929_v38 = vadd.s32 %v927_v9, %v925_v33  ;;  %v705_v45 = vshrl.u32 %v2005_v5, %v2198_v25  ;;  %v707_v47 = vshll.u32 %v2005_v5, %v2186_v14 }
  0xc3   : > { %v907_v43 = vadd.s32 %v905_v37, %v903_v34  ;;  %v708_v49 = vshrl.u32 %v2000_v46, %v2198_v25  ;;  %v899_v52 = vshrl.u32 %v894_v7, 16  ;;  %v2245_v54 = vadd.s32 %v924_v27, %v920_v19 }
  0xc4   : > { %v930_v60 = vadd.s32 %v929_v38, %v919_v18  ;;  %v2247_v1 = vor.u32 %v702_v40, %v701_v35  ;;  %v2249_v6 = vor.u32 %v705_v45, %v704_v41  ;;  %vm718_vm15 = vcmp.lt.s32.totalorder %v2195_v23, 3 }
  0xc5   : > { %v908_v2 = vadd.s32 %v907_v43, %v897_v22  ;;  %v709_v10 = vor.u32 %v708_v49, %v707_v47  ;;  %vm716_vm0 = vcmp.lt.s32.totalorder %v2195_v23, 1  ;;  %v730_v14 = vsel %vm718_vm15, %v2209_v39, %v729_v4 }
  0xc6   : > { %v931_v11 = vadd.s32 %v930_v60, %v921_v26  ;;  %v2256_v12 = vshll.u32 %v692_v8, 8  ;;  %vm717_vm1 = vcmp.lt.s32.totalorder %v2195_v23, 2  ;;  %v724_v63 = vsel %vm716_vm0, %v2247_v1, %v2249_v6 }
  0xc7   : > { %v2258_v7 = vadd.s32 %v908_v2, %v899_v52  ;;  %v726_v13 = vsel %vm718_vm15, %v709_v10, %v725_v3  ;;  %v556_v16 = vshrl.u32 %v2001_v48, %v2216_v50  ;;  %v728_v4 = vsel %vm716_vm0, %v2249_v6, %v709_v10 }
  0xc8   : > { %v935_v18 = vadd.s32 1, %v931_v11  ;;  %v727_v39 = vsel %vm717_vm1, %v724_v63, %v726_v13  ;;  %v559_v19 = vshrl.u32 %v2002_v53, %v2216_v50  ;;  %v932_v22 = vmul.u32 %v2166_v55, %v2220_v58 }
  0xc9   : > { %vm934_vm2 = vc.u32 %v2258_v7, %v2245_v54  ;;  %v731_v3 = vsel %vm717_vm1, %v728_v4, %v730_v14  ;;  %v733_v27 = vand.u32 65535, %v2256_v12  ;;  %v734_v29 = vshrl.u32 %v2256_v12, 16 }
  0xca   : > { %v936_v26 = vsel %vm934_vm2, %v935_v18, %v931_v11  ;;  %v735_v30 = vand.u32 65535, %v731_v3  ;;  %v736_v32 = vshrl.u32 %v731_v3, 16  ;;  %v757_v33 = vand.u32 65535, %v727_v39 }
  0xcb   : > { %v937_v31 = vadd.s32 %v936_v26, %v932_v22  ;;  %v758_v8 = vshrl.u32 %v727_v39, 16  ;;  %v2286_v34 = vshrl.u32 %v2001_v48, %v2169_v56  ;;  %v2290_v55 = vshrl.u32 %v2002_v53, %v2169_v56 }
  0xcc   : > { %v555_v58 = vshll.u32 %v2000_v46, %v2192_v20  ;;  %v529_v9 = vand.u32 2147483647, %v2149_v24  ;;  %v558_v35 = vshll.u32 %v2001_v48, %v2192_v20  ;;  %v738_v38 = vmul.u32 %v736_v32, %v733_v27 }
  0xcd   : > { %v938_v37 = vadd.s32 536870912, %v937_v31  ;;  %v739_v40 = vmul.u32 %v735_v30, %v734_v29  ;;  %vm564_vm3 = vcmp.lt.s32.totalorder %v2212_v44, 4  ;;  %v760_v43 = vmul.u32 %v758_v8, %v733_v27 }
  0xce   : > { %v2297_v41 = vor.u32 %v556_v16, %v555_v58  ;;  %v761_v45 = vmul.u32 %v757_v33, %v734_v29  ;;  %v560_v47 = vor.u32 %v559_v19, %v558_v35  ;;  %v737_v52 = vmul.u32 %v735_v30, %v733_v27 }
  0xcf   : > { %v2300_v49 = vshrl.u32 %v938_v37, 30  ;;  %v741_v60 = vshll.u32 %v738_v38, 16  ;;  %v700_v2 = vshrl.u32 %v2003_v57, %v2198_v25  ;;  %v740_v11 = vmul.u32 %v736_v32, %v734_v29 }
  0xd0   : > { %v759_v14 = vmul.u32 %v757_v33, %v733_v27  ;;  %v763_v63 = vshll.u32 %v760_v43, 16  ;;  %v743_v18 = vshll.u32 %v739_v40, 16  ;;  %v765_v4 = vshll.u32 %v761_v45, 16 }
  0xd1   : > { %v940_v13 = vshll.u32 %v2300_v49, 30  ;;  %vm745_vm4 = vc.u32 %v737_v52, %v741_v60  ;;  %v747_v16 = vadd.s32 %v741_v60, %v737_v52  ;;  %v721_v3 = vsel %vm719_vm10, %v709_v10, 2102212464 }
  0xd2   : > { %v746_v39 = vsel %vm745_vm4, 1, %v1999_v0  ;;  %vm767_vm5 = vc.u32 %v759_v14, %v763_v63  ;;  %v769_v19 = vadd.s32 %v763_v63, %v759_v14  ;;  %v762_v27 = vmul.u32 %v758_v8, %v734_v29 }
  0xd3   : > { %v2306_v22 = vsub.s32 %v937_v31, %v940_v13  ;;  %v748_v26 = vadd.s32 %v746_v39, %v740_v11  ;;  %vm749_vm6 = vc.u32 %v747_v16, %v743_v18  ;;  %v768_v30 = vsel %vm767_vm5, 1, %v1999_v0 }
  0xd4   : > { %v750_v25 = vsel %vm749_vm6, 1, %v1999_v0  ;;  %vm771_vm7 = vc.u32 %v769_v19, %v765_v4  ;;  %v742_v33 = vshrl.u32 %v738_v38, 16  ;;  %v720_v31 = vsel %vm716_vm0, %v700_v2, %v2247_v1 }
  0xd5   : > { %vm942_vm8 = vcmp.lt.s32.totalorder %v2306_v22, 0  ;;  %v943_v32 = vsub.s32 0, %v2306_v22  ;;  %v752_v58 = vadd.s32 %v750_v25, %v748_v26  ;;  %v722_v10 = vsel %vm718_vm15, %v2249_v6, %v721_v3 }
  0xd6   : > { %v770_v35 = vadd.s32 %v768_v30, %v762_v27  ;;  %v772_v29 = vsel %vm771_vm7, 1, %v1999_v0  ;;  %v570_v8 = vsel %vm564_vm3, %v2297_v41, 920167782  ;;  %v744_v52 = vshrl.u32 %v739_v40, 16 }
  0xd7   : > { %v944_v37 = vsel %vm942_vm8, %v943_v32, %v2306_v22  ;;  %v753_v38 = vadd.s32 %v752_v58, %v742_v33  ;;  %v574_v60 = vsel %vm564_vm3, %v560_v47, 1326507024  ;;  %vm841_vm9 = vcmp.lt.s32.totalorder %v2146_v21, 0 }
  0xd8   : > { %v945_v1 = vclz %v944_v37  ;;  %v764_v2 = vshrl.u32 %v760_v43, 16  ;;  %v774_v11 = vadd.s32 %v772_v29, %v770_v35  ;;  %v933_v6 = vadd.s32 %v2245_v54, %v2258_v7 }
  0xd9   : > { %v723_v14 = vsel %vm717_vm1, %v720_v31, %v722_v10  ;;  %v2332_v63 = vadd.s32 %v753_v38, %v744_v52  ;;  %v766_v13 = vshrl.u32 %v761_v45, 16  ;;  %v2334_v40 = vadd.s32 %v769_v19, %v765_v4 }
  0xda   : > { %v1826_v18 = vadd.s32 4294967294, %v945_v1  ;;  %v775_v16 = vadd.s32 %v774_v11, %v764_v2  ;;  %v547_v47 = vshrl.u32 %v2004_v59, %v2216_v50  ;;  %vm2340_vm10 = vcmp.le.f32.partialorder %v839_v28, 0.7853982 }
  0xdb   : > { %v963_v54 = vsub.s32 4, %v2300_v49  ;;  %v536_v23 = vand.u32 8388607, %v529_v9  ;;  %v549_v7 = vshll.u32 %v2004_v59, %v2192_v20  ;;  %v550_v45 = vshrl.u32 %v2005_v5, %v2216_v50 }
  0xdc   : > { %vm1827_vm11 = vcmp.lt.s32.totalorder %v1826_v18, 0  ;;  %v776_v39 = vadd.s32 %v775_v16, %v766_v13  ;;  %vm779_vm12 = vc.u32 %v2332_v63, %v2334_v40  ;;  %v546_v28 = vshll.u32 %v2003_v57, %v2192_v20 }
  0xdd   : > { %v948_v4 = vsel %vm1827_vm11, 0, %v1826_v18  ;;  %v551_v19 = vor.u32 %v550_v45, %v549_v7  ;;  %v552_v3 = vshll.u32 %v2005_v5, %v2192_v20  ;;  %v553_v26 = vshrl.u32 %v2000_v46, %v2216_v50 }
  0xde   : > { %v949_v25 = vsub.s32 32, %v948_v4  ;;  %v953_v27 = vsub.s32 4294967266, %v948_v4  ;;  %v780_v30 = vadd.s32 1, %v776_v39  ;;  %v548_v32 = vor.u32 %v547_v47, %v546_v28 }
  0xdf   : > { %v777_v33 = vmul.u32 %v2256_v12, %v723_v14  ;;  %v537_v58 = vor.u32 8388608, %v536_v23  ;;  %v554_v31 = vor.u32 %v553_v26, %v552_v3  ;;  %vm561_vm13 = vcmp.lt.s32.totalorder %v2212_v44, 1 }
  0xe0   : > { %v950_v10 = vshll.u32 %v2306_v22, %v948_v4  ;;  %v951_v35 = vshrl.u32 %v933_v6, %v949_v25  ;;  %v954_v29 = vadd.s32 127, %v953_v27  ;;  %v781_v20 = vsel %vm779_vm12, %v780_v30, %v776_v39 }
  0xe1   : > { %v964_v37 = vsel %vm841_vm9, %v963_v54, %v2300_v49  ;;  %v782_v52 = vadd.s32 %v781_v20, %v777_v33  ;;  %vm563_vm14 = vcmp.lt.s32.totalorder %v2212_v44, 3  ;;  %v573_v12 = vsel %vm561_vm13, %v551_v19, %v554_v31 }
  0xe2   : > { %v952_v38 = vor.u32 %v951_v35, %v950_v10  ;;  %v955_v1 = vshll.u32 %v954_v29, 23  ;;  %v569_v22 = vsel %vm561_vm13, %v548_v32, %v551_v19  ;;  %v571_v2 = vsel %vm563_vm14, %v554_v31, %v570_v8 }
  0xe3   : > { %v783_v11 = vadd.s32 536870912, %v782_v52  ;;  %vm562_vm15 = vcmp.lt.s32.totalorder %v2212_v44, 2  ;;  %v575_v49 = vsel %vm563_vm14, %v2297_v41, %v574_v60  ;;  %v2379_v6 = vshll.u32 %v537_v58, 8 }
  0xe4   : > { %v956_v14 = vor.u32 4788187, %v955_v1  ;;  %v966_v13 = vsel %vm2340_vm10, 0, %v964_v37  ;;  %v566_v18 = vsel %vm564_vm3, %v554_v31, 2102212464  ;;  %v576_v16 = vsel %vm562_vm15, %v573_v12, %v575_v49 }
  0xe5   : > { %v959_v8 = vcvt.s32.f32 %v952_v38  ;;  %v784_v47 = vshrl.u32 %v783_v11, 30  ;;  %v2389_v54 = vsel %vm562_vm15, %v569_v22, %v571_v2  ;;  %v580_v23 = vand.u32 65535, %v576_v16 }
  0xe6   : > { %v957_v41 = vand.u32 2147483647, %v956_v14  ;;  %v578_v60 = vand.u32 65535, %v2379_v6  ;;  %v579_v7 = vshrl.u32 %v2379_v6, 16  ;;  %v581_v45 = vshrl.u32 %v576_v16, 16 }
  0xe7   : > { %v2395_v39 = vor.u32 %v2286_v34, %v2175_v61  ;;  %v405_v28 = vor.u32 %v2290_v55, %v2179_v62  ;;  %v785_v4 = vshll.u32 %v784_v47, 30  ;;  %v545_v3 = vshrl.u32 %v2003_v57, %v2216_v50 }
  0xe8   : > { %v960_v26 = vmul.f32 %v959_v8, %v957_v41  ;;  %v983_v25 = vadd.s32 3, %v966_v13  ;;  %vm686_vm0 = vcmp.lt.s32.totalorder %v2155_v36, 0  ;;  %v583_v27 = vmul.u32 %v581_v45, %v578_v60 }
  0xe9   : > { %v2402_v30 = vmul.u32 %v580_v23, %v579_v7  ;;  %v2404_v33 = vsub.s32 %v782_v52, %v785_v4  ;;  %v565_v61 = vsel %vm561_vm13, %v545_v3, %v548_v32  ;;  %v567_v34 = vsel %vm563_vm14, %v551_v19, %v566_v18 }
  0xea   : > { %v603_v58 = vshrl.u32 %v2389_v54, 16  ;;  %v961_v31 = vxor.u32 2147483648, %v960_v26  ;;  %v582_v10 = vmul.u32 %v580_v23, %v578_v60  ;;  %v586_v50 = vshll.u32 %v583_v27, 16 }
  0xeb   : > { %v602_v35 = vand.u32 65535, %v2389_v54  ;;  %vm787_vm1 = vcmp.lt.s32.totalorder %v2404_v33, 0  ;;  %v788_v29 = vsub.s32 0, %v2404_v33  ;;  %v808_v20 = vsub.s32 4, %v784_v47 }
  0xec   : > { %v585_v37 = vmul.u32 %v581_v45, %v579_v7  ;;  %v962_v52 = vsel %vm841_vm9, %v961_v31, %v960_v26  ;;  %v588_v32 = vshll.u32 %v2402_v30, 16  ;;  %vm590_vm2 = vc.u32 %v582_v10, %v586_v50 }
  0xed   : > { %v592_v19 = vadd.s32 %v586_v50, %v582_v10  ;;  %v2420_v12 = vsel %vm2340_vm10, %v2146_v21, %v962_v52  ;;  %v789_v38 = vsel %vm787_vm1, %v788_v29, %v2404_v33  ;;  %v591_v1 = vsel %vm590_vm2, 1, %v1999_v0 }
  0xee   : > { %v605_v22 = vmul.u32 %v603_v58, %v578_v60  ;;  %v967_v2 = vmul.f32 %v2420_v12, %v2420_v12  ;;  %v790_v11 = vclz %v789_v38  ;;  %v593_v49 = vadd.s32 %v591_v1, %v585_v37 }
  0xef   : > { %vm594_vm3 = vc.u32 %v592_v19, %v588_v32  ;;  %v2426_v14 = vand.u32 3, %v983_v25  ;;  %v778_v13 = vadd.s32 %v2334_v40, %v2332_v63  ;;  %v606_v18 = vmul.u32 %v602_v35, %v579_v7 }
  0xf0   : > { %v595_v43 = vsel %vm594_vm3, 1, %v1999_v0  ;;  %v968_v16 = vmul.f32 -0.001358992, %v967_v2  ;;  %v975_v8 = vmul.f32 -0.00019511016, %v967_v2  ;;  %v1823_v54 = vadd.s32 4294967294, %v790_v11 }
  0xf1   : > { %v2433_v23 = vsel %vm562_vm15, %v565_v61, %v567_v34  ;;  %v2437_v41 = vsel %vm686_vm0, %v808_v20, %v784_v47  ;;  %v597_v45 = vadd.s32 %v595_v43, %v593_v49  ;;  %v604_v4 = vmul.u32 %v602_v35, %v578_v60 }
  0xf2   : > { %v608_v3 = vshll.u32 %v605_v22, 16  ;;  %v969_v26 = vadd.f32 0.041655596, %v968_v16  ;;  %v976_v25 = vadd.f32 0.008332121, %v975_v8  ;;  %vm1824_vm4 = vcmp.lt.s32.totalorder %v1823_v54, 0 }
  0xf3   : > { %v587_v63 = vshrl.u32 %v583_v27, 16  ;;  %vm2441_vm5 = vcmp.le.f32.partialorder %v684_v17, 0.7853982  ;;  %v793_v44 = vsel %vm1824_vm4, 0, %v1823_v54  ;;  %v610_v61 = vshll.u32 %v606_v18, 16 }
  0xf4   : > { %vm612_vm6 = vc.u32 %v604_v4, %v608_v3  ;;  %v614_v34 = vadd.s32 %v608_v3, %v604_v4  ;;  %v970_v31 = vmul.f32 %v969_v26, %v967_v2  ;;  %v977_v47 = vmul.f32 %v976_v25, %v967_v2 }
  0xf5   : > { %v794_v10 = vsub.s32 32, %v793_v44  ;;  %v607_v50 = vmul.u32 %v603_v58, %v579_v7  ;;  %v798_v60 = vsub.s32 4294967266, %v793_v44  ;;  %v598_v35 = vadd.s32 %v597_v45, %v587_v63 }
  0xf6   : > { %v613_v29 = vsel %vm612_vm6, 1, %v1999_v0  ;;  %vm616_vm7 = vc.u32 %v614_v34, %v610_v61  ;;  %v971_v27 = vadd.f32 -0.4999988, %v970_v31  ;;  %v978_v20 = vadd.f32 -0.16666654, %v977_v47 }
  0xf7   : > { %v796_v37 = vshrl.u32 %v778_v13, %v794_v10  ;;  %v615_v17 = vadd.s32 %v613_v29, %v607_v50  ;;  %vm986_vm8 = vcmp.eq.s32.totalorder %v2426_v14, 0  ;;  %v795_v52 = vshll.u32 %v2404_v33, %v793_v44 }
  0xf8   : > { %v799_v32 = vadd.s32 127, %v798_v60  ;;  %v589_v19 = vshrl.u32 %v2402_v30, 16  ;;  %v617_v38 = vsel %vm616_vm7, 1, %v1999_v0  ;;  %v972_v1 = vmul.f32 %v971_v27, %v967_v2 }
  0xf9   : > { %v979_v7 = vmul.f32 %v978_v20, %v967_v2  ;;  %vm985_vm9 = vcmp.lt.s32.totalorder %v2426_v14, 2  ;;  %v609_v58 = vshrl.u32 %v605_v22, 16  ;;  %v619_v11 = vadd.s32 %v617_v38, %v615_v17 }
  0xfa   : > { %vm982_vm10 = vweird.f32 %v2146_v21  ;;  %v797_v49 = vor.u32 %v796_v37, %v795_v52  ;;  %v800_v13 = vshll.u32 %v799_v32, 23  ;;  %v2452_v43 = vadd.s32 %v598_v35, %v589_v19 }
  0xfb   : > { %v374_v16 = vand.u32 2147483647, %v2143_v15  ;;  %vm409_vm11 = vcmp.lt.s32.totalorder %v2162_v51, 4  ;;  %v973_v33 = vadd.f32 1.0, %v972_v1  ;;  %v980_v30 = vadd.f32 1.0, %v979_v7 }
  0xfc   : > { %v611_v8 = vshrl.u32 %v606_v18, 16  ;;  %v620_v54 = vadd.s32 %v619_v11, %v609_v58  ;;  %vm989_vm12 = vcmp.eq.s32.totalorder %v2426_v14, 2  ;;  %v801_v2 = vor.u32 4788187, %v800_v13 }
  0xfd   : > { %v2457_v45 = vadd.s32 %v614_v34, %v610_v61  ;;  %v622_v22 = vmul.u32 %v2379_v6, %v2433_v23  ;;  %v981_v4 = vmul.f32 %v980_v30, %v2420_v12  ;;  %v990_v3 = vxor.u32 2147483648, %v973_v33 }
  0xfe   : > { %v811_v26 = vsel %vm2441_vm5, 0, %v2437_v41  ;;  %v621_v25 = vadd.s32 %v620_v54, %v611_v8  ;;  %v802_v63 = vand.u32 2147483647, %v801_v2  ;;  %v804_v44 = vcvt.s32.f32 %v797_v49 }
  0xff   : > { %vm624_vm13 = vc.u32 %v2452_v43, %v2457_v45  ;;  %v381_v18 = vand.u32 8388607, %v374_v16  ;;  %v987_v61 = vxor.u32 2147483648, %v981_v4  ;;  %v391_v6 = vshll.u32 %v2003_v57, %v2158_v42 }
 0x100   : > { %v625_v34 = vadd.s32 1, %v621_v25  ;;  %v392_v12 = vshrl.u32 %v2004_v59, %v2169_v56  ;;  %v991_v23 = vsel %vm989_vm12, %v990_v3, %v981_v4  ;;  %v805_v41 = vmul.f32 %v804_v44, %v802_v63 }
 0x101   : > { %v394_v31 = vshll.u32 %v2004_v59, %v2158_v42  ;;  %v395_v47 = vshrl.u32 %v2005_v5, %v2169_v56  ;;  %v988_v10 = vsel %vm986_vm8, %v973_v33, %v987_v61  ;;  %v397_v60 = vshll.u32 %v2005_v5, %v2158_v42 }
 0x102   : > { %v626_v50 = vsel %vm624_vm13, %v625_v34, %v621_v25  ;;  %v398_v35 = vshrl.u32 %v2000_v46, %v2169_v56  ;;  %v992_v29 = vsel %vm985_vm9, %v988_v10, %v991_v23  ;;  %v806_v27 = vxor.u32 2147483648, %v805_v41 }
 0x103   : > { %v627_v20 = vadd.s32 %v626_v50, %v622_v22  ;;  %v2487_v37 = vor.u32 %v395_v47, %v394_v31  ;;  %v993_v17 = vsel %vm982_vm10, nan, %v992_v29  ;;  %v382_v52 = vor.u32 8388608, %v381_v18 }
 0x104   : > { %v2491_v32 = vor.u32 %v392_v12, %v391_v6  ;;  %v2493_v19 = vor.u32 %v398_v35, %v397_v60  ;;  %v419_v42 = vsel %vm409_vm11, %v405_v28, 1326507024  ;;  %1047 = vmatpush.msra.mxu1 %v993_v17  ;;  %1850 = vmatpush.msra.mxu3 %v993_v17  ;;  %v807_v14 = vsel %vm686_vm0, %v806_v27, %v805_v41 }
 0x105   : > { %v628_v38 = vadd.s32 536870912, %v627_v20  ;;  %v415_v21 = vsel %vm409_vm11, %v2395_v39, 920167782  ;;  %v810_v1 = vsel %vm2441_vm5, %v2155_v36, %v807_v14  ;;  %v828_v7 = vadd.s32 3, %v811_v26 }
 0x106   : > { %vm406_vm14 = vcmp.lt.s32.totalorder %v2162_v51, 1  ;;  %v812_v62 = vmul.f32 %v810_v1, %v810_v1  ;;  %vm408_vm15 = vcmp.lt.s32.totalorder %v2162_v51, 3  ;;  %vm407_vm0 = vcmp.lt.s32.totalorder %v2162_v51, 2 }
 0x107   : > { %v2509_v55 = vshrl.u32 %v628_v38, 30  ;;  %v418_v28 = vsel %vm406_vm14, %v2487_v37, %v2493_v19  ;;  %v414_v40 = vsel %vm406_vm14, %v2491_v32, %v2487_v37  ;;  %v420_v58 = vsel %vm408_vm15, %v2395_v39, %v419_v42 }
 0x108   : > { %v2524_v11 = vshll.u32 %v382_v52, 8  ;;  %v813_v49 = vmul.f32 -0.001358992, %v812_v62  ;;  %v820_v13 = vmul.f32 -0.00019511016, %v812_v62  ;;  %v416_v30 = vsel %vm408_vm15, %v2493_v19, %v415_v21 }
 0x109   : > { %v630_v33 = vshll.u32 %v2509_v55, 30  ;;  %v421_v8 = vsel %vm407_vm0, %v418_v28, %v420_v58  ;;  %v829_v22 = vand.u32 3, %v828_v7  ;;  %v417_v39 = vsel %vm407_vm0, %v414_v40, %v416_v30 }
 0x10a   : > { %v814_v54 = vadd.f32 0.041655596, %v813_v49  ;;  %v821_v2 = vadd.f32 0.008332121, %v820_v13  ;;  %v423_v3 = vand.u32 65535, %v2524_v11  ;;  %v425_v26 = vand.u32 65535, %v421_v8 }
 0x10b   : > { %v631_v4 = vsub.s32 %v627_v20, %v630_v33  ;;  %v426_v25 = vshrl.u32 %v421_v8, 16  ;;  %v424_v61 = vshrl.u32 %v2524_v11, 16  ;;  %v448_v10 = vshrl.u32 %v417_v39, 16 }
 0x10c   : > { %v815_v63 = vmul.f32 %v814_v54, %v812_v62  ;;  %v822_v44 = vmul.f32 %v821_v2, %v812_v62  ;;  %vm830_vm2 = vcmp.lt.s32.totalorder %v829_v22, 2  ;;  %vm831_vm3 = vcmp.eq.s32.totalorder %v829_v22, 0 }
 0x10d   : > { %vm632_vm1 = vcmp.lt.s32.totalorder %v631_v4, 0  ;;  %v633_v18 = vsub.s32 0, %v631_v4  ;;  %v428_v34 = vmul.u32 %v426_v25, %v423_v3  ;;  %v2536_v31 = vmul.u32 %v425_v26, %v424_v61 }
 0x10e   : > { %v816_v6 = vadd.f32 -0.4999988, %v815_v63  ;;  %v823_v12 = vadd.f32 -0.16666654, %v822_v44  ;;  %v427_v35 = vmul.u32 %v425_v26, %v423_v3  ;;  %vm827_vm4 = vweird.f32 %v2155_v36 }
 0x10f   : > { %v634_v23 = vsel %vm632_vm1, %v633_v18, %v631_v4  ;;  %v431_v47 = vshll.u32 %v428_v34, 16  ;;  %vm834_vm5 = vcmp.eq.s32.totalorder %v829_v22, 2  ;;  %v430_v27 = vmul.u32 %v426_v25, %v424_v61 }
 0x110   : > { %v635_v41 = vclz %v634_v23  ;;  %v817_v50 = vmul.f32 %v816_v6, %v812_v62  ;;  %v824_v60 = vmul.f32 %v823_v12, %v812_v62  ;;  %v447_v20 = vand.u32 65535, %v417_v39 }
 0x111   : > { %vm435_vm6 = vc.u32 %v427_v35, %v431_v47  ;;  %v437_v42 = vadd.s32 %v431_v47, %v427_v35  ;;  %v433_v14 = vshll.u32 %v2536_v31, 16  ;;  %v450_v21 = vmul.u32 %v448_v10, %v423_v3 }
 0x112   : > { %v1820_v29 = vadd.s32 4294967294, %v635_v41  ;;  %v818_v17 = vadd.f32 1.0, %v817_v50  ;;  %v825_v52 = vadd.f32 1.0, %v824_v60  ;;  %v436_v38 = vsel %vm435_vm6, 1, %v1999_v0 }
 0x113   : > { %v438_v40 = vadd.s32 %v436_v38, %v430_v27  ;;  %v623_v58 = vadd.s32 %v2457_v45, %v2452_v43  ;;  %vm439_vm8 = vc.u32 %v437_v42, %v433_v14  ;;  %v451_v54 = vmul.u32 %v447_v20, %v424_v61 }
 0x114   : > { %vm1821_vm7 = vcmp.lt.s32.totalorder %v1820_v29, 0  ;;  %v826_v7 = vmul.f32 %v825_v52, %v810_v1  ;;  %v835_v62 = vxor.u32 2147483648, %v818_v17  ;;  %v440_v8 = vsel %vm439_vm8, 1, %v1999_v0 }
 0x115   : > { %v638_v28 = vsel %vm1821_vm7, 0, %v1820_v29  ;;  %v442_v26 = vadd.s32 %v440_v8, %v438_v40  ;;  %v453_v25 = vshll.u32 %v450_v21, 16  ;;  %v432_v44 = vshrl.u32 %v428_v34, 16 }
 0x116   : > { %v639_v49 = vsub.s32 32, %v638_v28  ;;  %v643_v13 = vsub.s32 4294967266, %v638_v28  ;;  %v832_v33 = vxor.u32 2147483648, %v826_v7  ;;  %v640_v30 = vshll.u32 %v631_v4, %v638_v28 }
 0x117   : > { %v836_v63 = vsel %vm834_vm5, %v835_v62, %v826_v7  ;;  %v449_v18 = vmul.u32 %v447_v20, %v423_v3  ;;  %v452_v12 = vmul.u32 %v448_v10, %v424_v61  ;;  %v455_v23 = vshll.u32 %v451_v54, 16 }
 0x118   : > { %v641_v2 = vshrl.u32 %v623_v58, %v639_v49  ;;  %v644_v39 = vadd.s32 127, %v643_v13  ;;  %v833_v1 = vsel %vm831_vm3, %v818_v17, %v832_v33  ;;  %v443_v50 = vadd.s32 %v442_v26, %v432_v44 }
 0x119   : > { %v837_v43 = vsel %vm830_vm2, %v833_v1, %v836_v63  ;;  %vm457_vm9 = vc.u32 %v449_v18, %v453_v25  ;;  %v459_v41 = vadd.s32 %v453_v25, %v449_v18  ;;  %v390_v3 = vshrl.u32 %v2003_v57, %v2169_v56 }
 0x11a   : > { %v642_v45 = vor.u32 %v641_v2, %v640_v30  ;;  %v645_v6 = vshll.u32 %v644_v39, 23  ;;  %v838_v4 = vsel %vm827_vm4, nan, %v837_v43  ;;  %v458_v60 = vsel %vm457_vm9, 1, %v1999_v0 }
 0x11b   : > { %1048 = vmatpush.msra.mxu1 %v838_v4  ;;  %1851 = vmatpush.msra.mxu3 %v838_v4  ;;  %v411_v22 = vsel %vm409_vm11, %v2493_v19, 2102212464  ;;  %v460_v61 = vadd.s32 %v458_v60, %v452_v12  ;;  %vm461_vm10 = vc.u32 %v459_v41, %v455_v23  ;;  %v434_v10 = vshrl.u32 %v2536_v31, 16 }
 0x11c   : > { %v646_v47 = vor.u32 4788187, %v645_v6  ;;  %v649_v34 = vcvt.s32.f32 %v642_v45  ;;  %v462_v35 = vsel %vm461_vm10, 1, %v1999_v0  ;;  %v454_v29 = vshrl.u32 %v450_v21, 16 }
 0x11d   : > { %v464_v27 = vadd.s32 %v462_v35, %v460_v61  ;;  %v410_v17 = vsel %vm406_vm14, %v390_v3, %v2491_v32  ;;  %v412_v56 = vsel %vm408_vm15, %v2487_v37, %v411_v22  ;;  %v444_v19 = vadd.s32 %v443_v50, %v434_v10 }
 0x11e   : > { %v647_v36 = vand.u32 2147483647, %v646_v47  ;;  %v456_v52 = vshrl.u32 %v451_v54, 16  ;;  %v463_v38 = vadd.s32 %v459_v41, %v455_v23  ;;  %vm531_vm11 = vcmp.lt.s32.totalorder %v2149_v24, 0 }
 0x11f   : > { %v465_v42 = vadd.s32 %v464_v27, %v454_v29  ;;  %v413_v31 = vsel %vm407_vm0, %v410_v17, %v412_v56  ;;  %vm2568_vm12 = vcmp.le.f32.partialorder %v529_v9, 0.7853982  ;;  %v653_v37 = vsub.s32 4, %v2509_v55 }
 0x120   : > { %v650_v20 = vmul.f32 %v649_v34, %v647_v36  ;;  %vm469_vm13 = vc.u32 %v444_v19, %v463_v38  ;;  %v467_v51 = vmul.u32 %v2524_v11, %v413_v31  ;;  %vm672_vm2 = vweird.f32 %v2149_v24 }
 0x121   : > { %v466_v21 = vadd.s32 %v465_v42, %v456_v52  ;;  %v654_v9 = vsel %vm531_vm11, %v653_v37, %v2509_v55  ;;  %v468_v35 = vadd.s32 %v463_v38, %v444_v19  ;;  %vm376_vm4 = vcmp.lt.s32.totalorder %v2143_v15, 0  ;;  %v1001_v38 = vld [vmem:[%s3105_s4 + $0x18] sm:$0xff] }
 0x122   : > { %v651_v14 = vxor.u32 2147483648, %v650_v20  ;;  %v656_v2 = vsel %vm2568_vm12, 0, %v654_v9  ;;  %vm2584_vm5 = vcmp.le.f32.partialorder %v374_v16, 0.7853982  ;;  %1019 = vperm.xlu2 %1918, %v1001_v38   ;;  %vm517_vm9 = vweird.f32 %v2143_v15 }
 0x123   : > { %v470_v28 = vadd.s32 1, %v466_v21  ;;  %v673_v18 = vadd.s32 3, %v656_v2  ;;  %vm1022_vm10 = vcmask 261120  }
 0x124   : > { %v652_v32 = vsel %vm531_vm11, %v651_v14, %v650_v20 }
 0x125   : > { %v655_v62 = vsel %vm2568_vm12, %v2149_v24, %v652_v32  ;;  %v471_v58 = vsel %vm469_vm13, %v470_v28, %v466_v21  ;;  %v674_v4 = vand.u32 3, %v673_v18 }
 0x126   : > { %v657_v40 = vmul.f32 %v655_v62, %v655_v62  ;;  %v472_v33 = vadd.s32 %v471_v58, %v467_v51 }
 0x127   : > { %vm676_vm15 = vcmp.eq.s32.totalorder %v674_v4, 0  ;;  %vm679_vm0 = vcmp.eq.s32.totalorder %v674_v4, 2  ;;  %vm675_vm1 = vcmp.lt.s32.totalorder %v674_v4, 2  ;;  %v996_v4 = vld [vmem:[%s3104_s3 + $0x10] sm:$0xff] }
 0x128   : > { %v658_v49 = vmul.f32 -0.001358992, %v657_v40  ;;  %v665_v13 = vmul.f32 -0.00019511016, %v657_v40  ;;  %v473_v54 = vadd.s32 536870912, %v472_v33 }
 0x12a   : > { %v659_v30 = vadd.f32 0.041655596, %v658_v49  ;;  %v666_v8 = vadd.f32 0.008332121, %v665_v13  ;;  %v474_v25 = vshrl.u32 %v473_v54, 30  ;;  %v1000_v13 = vld [vmem:[%s3105_s4 + $0x10] sm:$0xff] }
 0x12b   : > { %1014 = vperm.xlu2 %1918, %v1000_v13  }
 0x12c   : > { %v660_v39 = vmul.f32 %v659_v30, %v657_v40  ;;  %v667_v26 = vmul.f32 %v666_v8, %v657_v40  ;;  %v475_v44 = vshll.u32 %v474_v25, 30  ;;  %v498_v37 = vsub.s32 4, %v474_v25 }
 0x12e   : > { %v661_v1 = vadd.f32 -0.4999988, %v660_v39  ;;  %v668_v63 = vadd.f32 -0.16666654, %v667_v26  ;;  %v476_v45 = vsub.s32 %v472_v33, %v475_v44  ;;  %v499_v58 = vsel %vm376_vm4, %v498_v37, %v474_v25  ;;  %v1685_v25 = vld [vmem:[%s3107_s6] sm:$0xf] }
 0x12f   : > { %v501_v33 = vsel %vm2584_vm5, 0, %v499_v58 }
 0x130   : > { %v662_v11 = vmul.f32 %v661_v1, %v657_v40  ;;  %v669_v43 = vmul.f32 %v668_v63, %v657_v40  ;;  %vm477_vm14 = vcmp.lt.s32.totalorder %v476_v45, 0  ;;  %v478_v55 = vsub.s32 0, %v476_v45 }
 0x131   : > { %v518_v2 = vadd.s32 3, %v501_v33 }
 0x132   : > { %v663_v6 = vadd.f32 1.0, %v662_v11  ;;  %v670_v12 = vadd.f32 1.0, %v669_v43  ;;  %v479_v47 = vsel %vm477_vm14, %v478_v55, %v476_v45  ;;  %v994_v55 = vld [vmem:[%s3104_s3] sm:$0xff] }
 0x133   : > { %v480_v50 = vclz %v479_v47  ;;  %v519_v44 = vand.u32 3, %v518_v2  ;;  %1688 = vperm.xlu2 %1918, %v1685_v25  }
 0x134   : > { %v671_v23 = vmul.f32 %v670_v12, %v655_v62  ;;  %v680_v41 = vxor.u32 2147483648, %v663_v6 }
 0x135   : > { %v1817_v3 = vadd.s32 4294967294, %v480_v50  ;;  %vm521_vm6 = vcmp.eq.s32.totalorder %v519_v44, 0  ;;  %vm524_vm7 = vcmp.eq.s32.totalorder %v519_v44, 2  ;;  %vm520_vm8 = vcmp.lt.s32.totalorder %v519_v44, 2  ;;  %v1005_v50 = vpop.permute.xlu1 %1004 }
 0x136   : > { %v677_v60 = vxor.u32 2147483648, %v671_v23  ;;  %v681_v61 = vsel %vm679_vm0, %v680_v41, %v671_v23  ;;  %v997_v41 = vld [vmem:[%s3104_s3 + $0x18] sm:$0xff] }
 0x137   : > { %vm1818_vm3 = vcmp.lt.s32.totalorder %v1817_v3, 0 }
 0x138   : > { %v678_v22 = vsel %vm676_vm15, %v663_v6, %v677_v60  ;;  %v483_v10 = vsel %vm1818_vm3, 0, %v1817_v3 }
 0x139   : > { %v682_v36 = vsel %vm675_vm1, %v678_v22, %v681_v61  ;;  %v484_v29 = vsub.s32 32, %v483_v10  ;;  %v488_v27 = vsub.s32 4294967266, %v483_v10  ;;  %v485_v20 = vshll.u32 %v476_v45, %v483_v10 }
 0x13a   : > { %v683_v34 = vsel %vm672_vm2, nan, %v682_v36 }
 0x13b   : > { %1049 = vmatpush.msra.mxu1 %v683_v34  ;;  %1852 = vmatpush.msra.mxu3 %v683_v34  ;;  %v486_v17 = vshrl.u32 %v468_v35, %v484_v29  ;;  %v489_v56 = vadd.s32 127, %v488_v27  ;;  %v1010_v35 = vpop.permute.xlu0 %1009 }
 0x13d   : > { %v487_v52 = vor.u32 %v486_v17, %v485_v20  ;;  %v490_v42 = vshll.u32 %v489_v56, 23 }
 0x13f   : > { %v491_v14 = vor.u32 4788187, %v490_v42  ;;  %v494_v21 = vcvt.s32.f32 %v487_v52 }
 0x141   : > { %v492_v31 = vand.u32 2147483647, %v491_v14 }
 0x143   : > { %v495_v7 = vmul.f32 %v494_v21, %v492_v31 }
 0x145   : > { %v496_v32 = vxor.u32 2147483648, %v495_v7 }
 0x147   : > { %v497_v19 = vsel %vm376_vm4, %v496_v32, %v495_v7 }
 0x148   : > { %v500_v62 = vsel %vm2584_vm5, %v2143_v15, %v497_v19  ;;  %v995_v15 = vld [vmem:[%s3104_s3 + $0x8] sm:$0xff] }
 0x149   : > { %v502_v28 = vmul.f32 %v500_v62, %v500_v62 }
 0x14b   : > { %v503_v40 = vmul.f32 -0.001358992, %v502_v28  ;;  %v510_v51 = vmul.f32 -0.00019511016, %v502_v28 }
 0x14d   : > { %v504_v49 = vadd.f32 0.041655596, %v503_v40  ;;  %v511_v16 = vadd.f32 0.008332121, %v510_v51 }
 0x14f   : > { %v505_v9 = vmul.f32 %v504_v49, %v502_v28  ;;  %v512_v30 = vmul.f32 %v511_v16, %v502_v28 }
 0x151   : > { %v506_v8 = vadd.f32 -0.4999988, %v505_v9  ;;  %v513_v54 = vadd.f32 -0.16666654, %v512_v30 }
 0x153   : > { %v507_v39 = vmul.f32 %v506_v8, %v502_v28  ;;  %v514_v26 = vmul.f32 %v513_v54, %v502_v28 }
 0x155   : > { %v508_v1 = vadd.f32 1.0, %v507_v39  ;;  %v515_v63 = vadd.f32 1.0, %v514_v26 }
 0x157   : > { %v516_v18 = vmul.f32 %v515_v63, %v500_v62  ;;  %v525_v11 = vxor.u32 2147483648, %v508_v1 }
 0x159   : > { %v522_v43 = vxor.u32 2147483648, %v516_v18  ;;  %v526_v6 = vsel %vm524_vm7, %v525_v11, %v516_v18 }
 0x15b   : > { %v523_v45 = vsel %vm521_vm6, %v508_v1, %v522_v43 }
 0x15c   : > { %v527_v12 = vsel %vm520_vm8, %v523_v45, %v526_v6 }
 0x15d   : > { %v528_v23 = vsel %vm517_vm9, nan, %v527_v12 }
 0x15e   : > { %1050 = vmatpush.msra.mxu1 %v528_v23  ;;  %1853 = vmatpush.msra.mxu3 %v528_v23 }
 0x15f   : > { %1828 = vmatmul.msk.f32.vlgmr.msra.gmra.mxu1 %vm1022_vm10, %v994_v55  ;;  %1830 = vmatmul.msk.f32.vlgmr.msra.gmra.mxu3 %vm1022_vm10, %v996_v4 }
 0x167   : > { %1829 = vmatmul.msk.f32.gmra.mxu1 %vm1022_vm10, %v995_v15  ;;  %1831 = vmatmul.msk.f32.gmra.mxu3 %vm1022_vm10, %v997_v41 }
 0x17c   : > { %v1020_v47 = vpop.permute.xlu2 %1019 }
 0x185   : > { %v1015_v36 = vpop.permute.xlu2 %1014 }
 0x1dc   : > { %v1052_v60 = vpop.f32.mrf.mxu1 }
 0x1dd   : > { %v2619_v3 = vadd.f32 %v1052_v60, %v1005_v50 }
 0x1df   : > { %v1067_v22 = vand.u32 2139095040, %v2619_v3 }
 0x1e1   : > { %v1068_v61 = vshrl.u32 %v1067_v22, 23 }
 0x1e2   : > { %v1058_v34 = vpop.f32.mrf.mxu3 }
 0x1e3   : > { %v2622_v10 = vadd.f32 %v1058_v34, %v1015_v36  ;;  %v1832_v29 = vadd.s32 4294967169, %v1068_v61 }
 0x1e4   : > { %v1055_v27 = vpop.f32.mrf.mxu1 }
 0x1e5   : > { %v1377_v20 = vand.u32 2139095040, %v2622_v10  ;;  %v2625_v17 = vadd.f32 %v1055_v27, %v1010_v35  ;;  %v1074_v42 = vadd.s32 1, %v1832_v29  ;;  %v1374_v18 = vand.u32 2147483647, %v2622_v10 }
 0x1e7   : > { %v1378_v56 = vshrl.u32 %v1377_v20, 23  ;;  %v1222_v52 = vand.u32 2139095040, %v2625_v17  ;;  %vm1075_vm11 = vcmp.gt.s32.totalorder %v1074_v42, 0  ;;  %v2690_v36 = vand.u32 8388607, %v1374_v18 }
 0x1e8   : > { %v1076_v37 = vsel %vm1075_vm11, %v1074_v42, 0 }
 0x1e9   : > { %v1838_v14 = vadd.s32 4294967169, %v1378_v56  ;;  %v1223_v31 = vshrl.u32 %v1222_v52, 23  ;;  %v2634_v58 = vand.u32 31, %v1076_v37  ;;  %v2644_v54 = vshrl.u32 %v1076_v37, 5 }
 0x1ea   : > { %v1061_v21 = vpop.f32.mrf.mxu3 }
 0x1eb   : > { %v1384_v7 = vadd.s32 1, %v1838_v14  ;;  %v1835_v32 = vadd.s32 4294967169, %v1223_v31  ;;  %v2628_v24 = vadd.f32 %v1061_v21, %v1020_v47  ;;  %v2642_v9 = vsub.s32 32, %v2634_v58 }
 0x1ec   : > { %v2650_v39 = vshll.u32 %v2000_v46, %v2634_v58 }
 0x1ed   : > { %vm1385_vm12 = vcmp.gt.s32.totalorder %v1384_v7, 0  ;;  %v1229_v19 = vadd.s32 1, %v1835_v32  ;;  %v1532_v38 = vand.u32 2139095040, %v2628_v24  ;;  %v1529_v51 = vand.u32 2147483647, %v2628_v24 }
 0x1ee   : > { %v1386_v62 = vsel %vm1385_vm12, %v1384_v7, 0  ;;  %v2663_v11 = vshrl.u32 %v2001_v48, %v2642_v9  ;;  %v2671_v12 = vshrl.u32 %v2002_v53, %v2642_v9 }
 0x1ef   : > { %v2631_v28 = vand.u32 31, %v1386_v62  ;;  %v1533_v40 = vshrl.u32 %v1532_v38, 23  ;;  %vm1230_vm13 = vcmp.gt.s32.totalorder %v1229_v19, 0  ;;  %v1536_v33 = vand.u32 8388607, %v1529_v51 }
 0x1f0   : > { %v1231_v13 = vsel %vm1230_vm13, %v1229_v19, 0  ;;  %v2656_v63 = vshrl.u32 %v1386_v62, 5 }
 0x1f1   : > { %v1841_v49 = vadd.s32 4294967169, %v1533_v40  ;;  %v2637_v16 = vsub.s32 32, %v2631_v28  ;;  %v1537_v8 = vor.u32 8388608, %v1536_v33  ;;  %v2646_v2 = vand.u32 31, %v1231_v13 }
 0x1f2   : > { %v1400_v43 = vshll.u32 %v2000_v46, %v2631_v28  ;;  %v1403_v45 = vshll.u32 %v2001_v48, %v2631_v28  ;;  %v2673_v55 = vshrl.u32 %v1231_v13, 5  ;;  %vm1409_vm15 = vcmp.lt.s32.totalorder %v2656_v63, 4 }
 0x1f3   : > { %v1539_v30 = vadd.s32 1, %v1841_v49  ;;  %v1401_v26 = vshrl.u32 %v2001_v48, %v2637_v16  ;;  %v1404_v1 = vshrl.u32 %v2002_v53, %v2637_v16  ;;  %v2658_v44 = vshll.u32 %v1537_v8, 8 }
 0x1f4   : > { %v2676_v4 = vsub.s32 32, %v2646_v2  ;;  %v2680_v23 = vshll.u32 %v2000_v46, %v2646_v2  ;;  %vm1406_vm8 = vcmp.lt.s32.totalorder %v2656_v63, 1  ;;  %vm1408_vm9 = vcmp.lt.s32.totalorder %v2656_v63, 3 }
 0x1f5   : > { %vm1540_vm14 = vcmp.gt.s32.totalorder %v1539_v30, 0  ;;  %v2682_v15 = vor.u32 %v1401_v26, %v1400_v43  ;;  %v1405_v41 = vor.u32 %v1404_v1, %v1403_v45  ;;  %v1578_v61 = vand.u32 65535, %v2658_v44 }
 0x1f6   : > { %v1541_v25 = vsel %vm1540_vm14, %v1539_v30, 0  ;;  %v1579_v26 = vshrl.u32 %v2658_v44, 16  ;;  %vm1407_vm11 = vcmp.lt.s32.totalorder %v2656_v63, 2  ;;  %vm1254_vm13 = vcmp.lt.s32.totalorder %v2673_v55, 4 }
 0x1f7   : > { %v1543_v6 = vand.u32 31, %v1541_v25  ;;  %v1542_v47 = vshrl.u32 %v1541_v25, 5  ;;  %v1239_v63 = vshll.u32 %v2004_v59, %v2646_v2 }
 0x1f9   : > { %v1544_v50 = vsub.s32 32, %v1543_v6  ;;  %v1555_v60 = vshll.u32 %v2000_v46, %v1543_v6  ;;  %v1558_v22 = vshll.u32 %v2001_v48, %v1543_v6  ;;  %v1546_v29 = vshll.u32 %v2003_v57, %v1543_v6 }
 0x1fa   : > { %v1549_v20 = vshll.u32 %v2004_v59, %v1543_v6  ;;  %v1552_v52 = vshll.u32 %v2005_v5, %v1543_v6  ;;  %vm1564_vm0 = vcmp.lt.s32.totalorder %v1542_v47, 4  ;;  %vm1561_vm1 = vcmp.lt.s32.totalorder %v1542_v47, 1 }
 0x1fb   : > { %v1556_v34 = vshrl.u32 %v2001_v48, %v1544_v50  ;;  %v1559_v35 = vshrl.u32 %v2002_v53, %v1544_v50  ;;  %v1547_v27 = vshrl.u32 %v2004_v59, %v1544_v50  ;;  %v1550_v56 = vshrl.u32 %v2005_v5, %v1544_v50 }
 0x1fc   : > { %v1553_v42 = vshrl.u32 %v2000_v46, %v1544_v50  ;;  %v1545_v7 = vshrl.u32 %v2003_v57, %v1544_v50  ;;  %vm1562_vm2 = vcmp.lt.s32.totalorder %v1542_v47, 2  ;;  %vm1563_vm3 = vcmp.lt.s32.totalorder %v1542_v47, 3 }
 0x1fd   : > { %v1557_v14 = vor.u32 %v1556_v34, %v1555_v60  ;;  %v1560_v31 = vor.u32 %v1559_v35, %v1558_v22  ;;  %v1548_v21 = vor.u32 %v1547_v27, %v1546_v29  ;;  %v1551_v32 = vor.u32 %v1550_v56, %v1549_v20 }
 0x1fe   : > { %v1554_v19 = vor.u32 %v1553_v42, %v1552_v52  ;;  %v1415_v6 = vsel %vm1409_vm15, %v2682_v15, 920167782  ;;  %v1419_v50 = vsel %vm1409_vm15, %v1405_v41, 1326507024  ;;  %v1382_v29 = vor.u32 8388608, %v2690_v36 }
 0x1ff   : > { %v1570_v38 = vsel %vm1564_vm0, %v1557_v14, 920167782  ;;  %v1574_v37 = vsel %vm1564_vm0, %v1560_v31, 1326507024  ;;  %v1569_v40 = vsel %vm1561_vm1, %v1548_v21, %v1551_v32  ;;  %v1565_v33 = vsel %vm1561_vm1, %v1545_v7, %v1548_v21 }
 0x200   : > { %v1566_v62 = vsel %vm1564_vm0, %v1554_v19, 2102212464  ;;  %v1571_v49 = vsel %vm1563_vm3, %v1554_v19, %v1570_v38  ;;  %v1573_v13 = vsel %vm1561_vm1, %v1551_v32, %v1554_v19  ;;  %v1575_v8 = vsel %vm1563_vm3, %v1557_v14, %v1574_v37 }
 0x201   : > { %v1572_v30 = vsel %vm1562_vm2, %v1569_v40, %v1571_v49  ;;  %v1567_v1 = vsel %vm1563_vm3, %v1551_v32, %v1566_v62  ;;  %v1576_v25 = vsel %vm1562_vm2, %v1573_v13, %v1575_v8  ;;  %v1391_v27 = vshll.u32 %v2003_v57, %v2631_v28 }
 0x202   : > { %v1602_v43 = vand.u32 65535, %v1572_v30  ;;  %v1603_v45 = vshrl.u32 %v1572_v30, 16  ;;  %v1580_v60 = vand.u32 65535, %v1576_v25  ;;  %v1581_v22 = vshrl.u32 %v1576_v25, 16 }
 0x203   : > { %v2713_v20 = vsel %vm1562_vm2, %v1565_v33, %v1567_v1  ;;  %v1392_v42 = vshrl.u32 %v2004_v59, %v2637_v16  ;;  %v1394_v47 = vshll.u32 %v2004_v59, %v2631_v28  ;;  %v1395_v49 = vshrl.u32 %v2005_v5, %v2637_v16 }
 0x204   : > { %v1605_v34 = vmul.u32 %v1603_v45, %v1578_v61  ;;  %v1606_v35 = vmul.u32 %v1602_v43, %v1579_v26  ;;  %v1583_v56 = vmul.u32 %v1581_v22, %v1578_v61  ;;  %v1584_v52 = vmul.u32 %v1580_v60, %v1579_v26 }
 0x205   : > { %v1582_v14 = vmul.u32 %v1580_v60, %v1578_v61  ;;  %v1604_v31 = vmul.u32 %v1602_v43, %v1578_v61  ;;  %v1607_v41 = vmul.u32 %v1603_v45, %v1579_v26  ;;  %v1585_v7 = vmul.u32 %v1581_v22, %v1579_v26 }
 0x206   : > { %v1608_v21 = vshll.u32 %v1605_v34, 16  ;;  %v1586_v32 = vshll.u32 %v1583_v56, 16  ;;  %v1609_v19 = vshrl.u32 %v1605_v34, 16  ;;  %v1610_v38 = vshll.u32 %v1606_v35, 16 }
 0x207   : > { %v1588_v36 = vshll.u32 %v1584_v52, 16  ;;  %v1393_v33 = vor.u32 %v1392_v42, %v1391_v27  ;;  %v2724_v26 = vor.u32 %v1395_v49, %v1394_v47  ;;  %v1397_v43 = vshll.u32 %v2005_v5, %v2631_v28 }
 0x208   : > { %vm1612_vm4 = vc.u32 %v1604_v31, %v1608_v21  ;;  %v1614_v37 = vadd.s32 %v1608_v21, %v1604_v31  ;;  %vm1590_vm5 = vc.u32 %v1582_v14, %v1586_v32  ;;  %v1592_v62 = vadd.s32 %v1586_v32, %v1582_v14 }
 0x209   : > { %v1613_v40 = vsel %vm1612_vm4, 1, %v1999_v0  ;;  %v1591_v61 = vsel %vm1590_vm5, 1, %v1999_v0  ;;  %v1398_v45 = vshrl.u32 %v2000_v46, %v2637_v16  ;;  %v1587_v60 = vshrl.u32 %v1583_v56, 16 }
 0x20a   : > { %v1615_v13 = vadd.s32 %v1613_v40, %v1607_v41  ;;  %vm1616_vm6 = vc.u32 %v1614_v37, %v1610_v38  ;;  %v1593_v30 = vadd.s32 %v1591_v61, %v1585_v7  ;;  %vm1594_vm7 = vc.u32 %v1592_v62, %v1588_v36 }
 0x20b   : > { %v1617_v8 = vsel %vm1616_vm6, 1, %v1999_v0  ;;  %v1595_v1 = vsel %vm1594_vm7, 1, %v1999_v0  ;;  %v1611_v34 = vshrl.u32 %v1606_v35, 16  ;;  %v1399_v42 = vor.u32 %v1398_v45, %v1397_v43 }
 0x20c   : > { %v1619_v25 = vadd.s32 %v1617_v8, %v1615_v13  ;;  %v1597_v22 = vadd.s32 %v1595_v1, %v1593_v30  ;;  %v1414_v14 = vsel %vm1406_vm8, %v1393_v33, %v2724_v26  ;;  %v1589_v31 = vshrl.u32 %v1584_v52, 16 }
 0x20d   : > { %v1420_v28 = vsel %vm1408_vm9, %v2682_v15, %v1419_v50  ;;  %v2739_v21 = vshll.u32 %v1382_v29, 8  ;;  %v1416_v35 = vsel %vm1408_vm9, %v1399_v42, %v1415_v6  ;;  %v1418_v7 = vsel %vm1406_vm8, %v2724_v26, %v1399_v42 }
 0x20e   : > { %v1620_v27 = vadd.s32 %v1619_v25, %v1609_v19  ;;  %v1598_v41 = vadd.s32 %v1597_v22, %v1587_v60  ;;  %v2749_v52 = vadd.s32 %v1614_v37, %v1610_v38  ;;  %v1417_v19 = vsel %vm1407_vm11, %v1414_v14, %v1416_v35 }
 0x20f   : > { %v1421_v15 = vsel %vm1407_vm11, %v1418_v7, %v1420_v28  ;;  %v1246_v50 = vshrl.u32 %v2001_v48, %v2676_v4  ;;  %v1622_v6 = vmul.u32 %v2658_v44, %v2713_v20  ;;  %v1423_v36 = vand.u32 65535, %v2739_v21 }
 0x210   : > { %v1621_v56 = vadd.s32 %v1620_v27, %v1611_v34  ;;  %v2747_v32 = vadd.s32 %v1598_v41, %v1589_v31  ;;  %v1424_v38 = vshrl.u32 %v2739_v21, 16  ;;  %v1425_v37 = vand.u32 65535, %v1421_v15 }
 0x211   : > { %v1426_v47 = vshrl.u32 %v1421_v15, 16  ;;  %v2765_v62 = vshll.u32 %v2001_v48, %v2646_v2  ;;  %v1447_v49 = vand.u32 65535, %v1417_v19  ;;  %v1448_v61 = vshrl.u32 %v1417_v19, 16 }
 0x212   : > { %v1625_v29 = vadd.s32 1, %v1621_v56  ;;  %vm1624_vm12 = vc.u32 %v2747_v32, %v2749_v52  ;;  %v1390_v44 = vshrl.u32 %v2003_v57, %v2637_v16  ;;  %v1429_v30 = vmul.u32 %v1425_v37, %v1424_v38 }
 0x213   : > { %v1428_v20 = vmul.u32 %v1426_v47, %v1423_v36  ;;  %v2770_v8 = vor.u32 %v1246_v50, %v2680_v23  ;;  %v1249_v1 = vshrl.u32 %v2002_v53, %v2676_v4  ;;  %v1450_v25 = vmul.u32 %v1448_v61, %v1423_v36 }
 0x214   : > { %v1626_v40 = vsel %vm1624_vm12, %v1625_v29, %v1621_v56  ;;  %v1451_v43 = vmul.u32 %v1447_v49, %v1424_v38  ;;  %v1410_v60 = vsel %vm1406_vm8, %v1390_v44, %v1393_v33  ;;  %v1427_v22 = vmul.u32 %v1425_v37, %v1423_v36 }
 0x215   : > { %v1627_v13 = vadd.s32 %v1626_v40, %v1622_v6  ;;  %v1431_v34 = vshll.u32 %v1428_v20, 16  ;;  %v1411_v16 = vsel %vm1409_vm15, %v1399_v42, 2102212464  ;;  %v1430_v27 = vmul.u32 %v1426_v47, %v1424_v38 }
 0x216   : > { %v1449_v14 = vmul.u32 %v1447_v49, %v1423_v36  ;;  %v1453_v23 = vshll.u32 %v1450_v25, 16  ;;  %v1433_v41 = vshll.u32 %v1429_v30, 16  ;;  %v1455_v56 = vshll.u32 %v1451_v43, 16 }
 0x217   : > { %v1628_v45 = vadd.s32 536870912, %v1627_v13  ;;  %vm1435_vm14 = vc.u32 %v1427_v22, %v1431_v34  ;;  %v1437_v53 = vadd.s32 %v1431_v34, %v1427_v22  ;;  %v1452_v19 = vmul.u32 %v1448_v61, %v1424_v38 }
 0x218   : > { %v1436_v28 = vsel %vm1435_vm14, 1, %v1999_v0  ;;  %vm1457_vm0 = vc.u32 %v1449_v14, %v1453_v23  ;;  %v1459_v35 = vadd.s32 %v1453_v23, %v1449_v14  ;;  %v1412_v42 = vsel %vm1408_vm9, %v2724_v26, %v1411_v16 }
 0x219   : > { %v2779_v31 = vshrl.u32 %v1628_v45, 30  ;;  %v1438_v7 = vadd.s32 %v1436_v28, %v1430_v27  ;;  %vm1439_vm1 = vc.u32 %v1437_v53, %v1433_v41  ;;  %v1458_v50 = vsel %vm1457_vm0, 1, %v1999_v0 }
 0x21a   : > { %v1440_v15 = vsel %vm1439_vm1, 1, %v1999_v0  ;;  %vm1461_vm15 = vc.u32 %v1459_v35, %v1455_v56  ;;  %v1432_v29 = vshrl.u32 %v1428_v20, 16  ;;  %v1460_v37 = vadd.s32 %v1458_v50, %v1452_v19 }
 0x21b   : > { %v1630_v33 = vshll.u32 %v2779_v31, 30  ;;  %v1442_v36 = vadd.s32 %v1440_v15, %v1438_v7  ;;  %v1434_v47 = vshrl.u32 %v1429_v30, 16  ;;  %v1454_v40 = vshrl.u32 %v1450_v25, 16 }
 0x21c   : > { %v1462_v49 = vsel %vm1461_vm15, 1, %v1999_v0  ;;  %v1219_v44 = vand.u32 2147483647, %v2625_v17  ;;  %v1250_v26 = vor.u32 %v1249_v1, %v2765_v62  ;;  %v1260_v22 = vsel %vm1254_vm13, %v2770_v8, 920167782 }
 0x21d   : > { %v1631_v6 = vsub.s32 %v1627_v13, %v1630_v33  ;;  %v1443_v61 = vadd.s32 %v1442_v36, %v1432_v29  ;;  %v1464_v45 = vadd.s32 %v1462_v49, %v1460_v37  ;;  %vm1531_vm3 = vcmp.lt.s32.totalorder %v2628_v24, 0 }
 0x21e   : > { %v1413_v13 = vsel %vm1407_vm11, %v1410_v60, %v1412_v42  ;;  %v1456_v20 = vshrl.u32 %v1451_v43, 16  ;;  %v2799_v34 = vadd.s32 %v1459_v35, %v1455_v56  ;;  %v1226_v62 = vand.u32 8388607, %v1219_v44 }
 0x21f   : > { %vm1632_vm2 = vcmp.lt.s32.totalorder %v1631_v6, 0  ;;  %v1633_v38 = vsub.s32 0, %v1631_v6  ;;  %v2797_v25 = vadd.s32 %v1443_v61, %v1434_v47  ;;  %v1465_v16 = vadd.s32 %v1464_v45, %v1454_v40 }
 0x220   : > { %v1237_v1 = vshrl.u32 %v2004_v59, %v2676_v4  ;;  %v1240_v14 = vshrl.u32 %v2005_v5, %v2676_v4  ;;  %v1242_v43 = vshll.u32 %v2005_v5, %v2646_v2  ;;  %v1243_v60 = vshrl.u32 %v2000_v46, %v2676_v4 }
 0x221   : > { %v1634_v30 = vsel %vm1632_vm2, %v1633_v38, %v1631_v6  ;;  %v1466_v23 = vadd.s32 %v1465_v16, %v1456_v20  ;;  %v1264_v41 = vsel %vm1254_vm13, %v1250_v26, 1326507024  ;;  %v1653_v28 = vsub.s32 4, %v2779_v31 }
 0x222   : > { %v1635_v27 = vclz %v1634_v30  ;;  %vm1469_vm4 = vc.u32 %v2797_v25, %v2799_v34  ;;  %v1236_v35 = vshll.u32 %v2003_v57, %v2646_v2  ;;  %v2820_v33 = vor.u32 %v1240_v14, %v1239_v63 }
 0x223   : > { %v1470_v56 = vadd.s32 1, %v1466_v23  ;;  %v1244_v7 = vor.u32 %v1243_v60, %v1242_v43  ;;  %v1623_v19 = vadd.s32 %v2749_v52, %v2747_v32  ;;  %v1467_v42 = vmul.u32 %v2739_v21, %v1413_v13 }
 0x224   : > { %v1842_v53 = vadd.s32 4294967294, %v1635_v27  ;;  %v1227_v15 = vor.u32 8388608, %v1226_v62  ;;  %v1238_v36 = vor.u32 %v1237_v1, %v1236_v35  ;;  %vm1253_vm6 = vcmp.lt.s32.totalorder %v2673_v55, 3 }
 0x225   : > { %v1471_v29 = vsel %vm1469_vm4, %v1470_v56, %v1466_v23  ;;  %vm1251_vm7 = vcmp.lt.s32.totalorder %v2673_v55, 1  ;;  %v1265_v2 = vsel %vm1253_vm6, %v2770_v8, %v1264_v41  ;;  %vm2832_vm8 = vcmp.le.f32.partialorder %v1529_v51, 0.7853982 }
 0x226   : > { %vm1843_vm5 = vcmp.lt.s32.totalorder %v1842_v53, 0  ;;  %v1654_v21 = vsel %vm1531_vm3, %v1653_v28, %v2779_v31  ;;  %v1472_v52 = vadd.s32 %v1471_v29, %v1467_v42  ;;  %v1263_v40 = vsel %vm1251_vm7, %v2820_v33, %v1244_v7 }
 0x227   : > { %v1638_v50 = vsel %vm1843_vm5, 0, %v1842_v53  ;;  %vm1252_vm9 = vcmp.lt.s32.totalorder %v2673_v55, 2  ;;  %v1259_v51 = vsel %vm1251_vm7, %v1238_v36, %v2820_v33  ;;  %v1261_v45 = vsel %vm1253_vm6, %v1244_v7, %v1260_v22 }
 0x228   : > { %v1639_v37 = vsub.s32 32, %v1638_v50  ;;  %v1643_v47 = vsub.s32 4294967266, %v1638_v50  ;;  %v1640_v49 = vshll.u32 %v1631_v6, %v1638_v50  ;;  %v1473_v8 = vadd.s32 536870912, %v1472_v52 }
 0x229   : > { %v1266_v31 = vsel %vm1252_vm9, %v1263_v40, %v1265_v2  ;;  %v2850_v20 = vshll.u32 %v1227_v15, 8  ;;  %v1093_v30 = vshll.u32 %v2001_v48, %v2634_v58  ;;  %v1656_v16 = vsel %vm2832_vm8, 0, %v1654_v21 }
 0x22a   : > { %v1641_v38 = vshrl.u32 %v1623_v19, %v1639_v37  ;;  %v1644_v61 = vadd.s32 127, %v1643_v47  ;;  %v1270_v6 = vand.u32 65535, %v1266_v31  ;;  %v2856_v27 = vshrl.u32 %v1473_v8, 30 }
 0x22b   : > { %v1271_v62 = vshrl.u32 %v1266_v31, 16  ;;  %vm1099_vm11 = vcmp.lt.s32.totalorder %v2644_v54, 4  ;;  %v1262_v1 = vsel %vm1252_vm9, %v1259_v51, %v1261_v45  ;;  %v1268_v14 = vand.u32 65535, %v2850_v20 }
 0x22c   : > { %v1642_v26 = vor.u32 %v1641_v38, %v1640_v49  ;;  %v1645_v13 = vshll.u32 %v1644_v61, 23  ;;  %v1269_v23 = vshrl.u32 %v2850_v20, 16  ;;  %v2865_v63 = vor.u32 %v2663_v11, %v2650_v39 }
 0x22d   : > { %v1095_v48 = vor.u32 %v2671_v12, %v1093_v30  ;;  %v1475_v43 = vshll.u32 %v2856_v27, 30  ;;  %v1235_v60 = vshrl.u32 %v2003_v57, %v2676_v4  ;;  %v1273_v28 = vmul.u32 %v1271_v62, %v1268_v14 }
 0x22e   : > { %v1646_v22 = vor.u32 4788187, %v1645_v13  ;;  %v1649_v53 = vcvt.s32.f32 %v1642_v26  ;;  %v2871_v56 = vmul.u32 %v1270_v6, %v1269_v23  ;;  %v1673_v35 = vadd.s32 3, %v1656_v16 }
 0x22f   : > { %v2873_v19 = vsub.s32 %v1472_v52, %v1475_v43  ;;  %v1255_v42 = vsel %vm1251_vm7, %v1235_v60, %v1238_v36  ;;  %v1293_v39 = vshrl.u32 %v1262_v1, 16  ;;  %v1256_v12 = vsel %vm1254_vm13, %v1244_v7, 2102212464 }
 0x230   : > { %v1647_v41 = vand.u32 2147483647, %v1646_v22  ;;  %v1272_v15 = vmul.u32 %v1270_v6, %v1268_v14  ;;  %v1276_v50 = vshll.u32 %v1273_v28, 16  ;;  %v1275_v29 = vmul.u32 %v1271_v62, %v1269_v23 }
 0x231   : > { %vm1477_vm12 = vcmp.lt.s32.totalorder %v2873_v19, 0  ;;  %v1478_v4 = vsub.s32 0, %v2873_v19  ;;  %v1292_v37 = vand.u32 65535, %v1262_v1  ;;  %v1278_v2 = vshll.u32 %v2871_v56, 16 }
 0x232   : > { %v1650_v11 = vmul.f32 %v1649_v53, %v1647_v41  ;;  %vm1280_vm14 = vc.u32 %v1272_v15, %v1276_v50  ;;  %v1282_v21 = vadd.s32 %v1276_v50, %v1272_v15  ;;  %v1257_v52 = vsel %vm1253_vm6, %v2820_v33, %v1256_v12 }
 0x233   : > { %v1479_v36 = vsel %vm1477_vm12, %v1478_v4, %v2873_v19  ;;  %v1281_v7 = vsel %vm1280_vm14, 1, %v1999_v0  ;;  %v1295_v40 = vmul.u32 %v1293_v39, %v1268_v14  ;;  %v2891_v8 = vsel %vm1099_vm11, %v1095_v48, 1326507024 }
 0x234   : > { %v1651_v47 = vxor.u32 2147483648, %v1650_v11  ;;  %v1480_v38 = vclz %v1479_v36  ;;  %v1283_v61 = vadd.s32 %v1281_v7, %v1275_v29  ;;  %vm1284_vm13 = vc.u32 %v1282_v21, %v1278_v2 }
 0x235   : > { %v2898_v45 = vand.u32 3, %v1673_v35  ;;  %v1468_v33 = vadd.s32 %v2799_v34, %v2797_v25  ;;  %v1285_v13 = vsel %vm1284_vm13, 1, %v1999_v0  ;;  %v1296_v6 = vmul.u32 %v1292_v37, %v1269_v23 }
 0x236   : > { %v1652_v49 = vsel %vm1531_vm3, %v1651_v47, %v1650_v11  ;;  %v1839_v26 = vadd.s32 4294967294, %v1480_v38  ;;  %v2907_v30 = vsel %vm1252_vm9, %v1255_v42, %v1257_v52  ;;  %v1287_v16 = vadd.s32 %v1285_v13, %v1283_v61 }
 0x237   : > { %v2896_v51 = vsel %vm2832_vm8, %v2628_v24, %v1652_v49  ;;  %v1294_v32 = vmul.u32 %v1292_v37, %v1268_v14  ;;  %v1298_v62 = vshll.u32 %v1295_v40, 16  ;;  %v1498_v48 = vsub.s32 4, %v2856_v27 }
 0x238   : > { %v1657_v31 = vmul.f32 %v2896_v51, %v2896_v51  ;;  %vm1840_vm0 = vcmp.lt.s32.totalorder %v1839_v26, 0  ;;  %vm1376_vm1 = vcmp.lt.s32.totalorder %v2622_v10, 0  ;;  %v1277_v34 = vshrl.u32 %v1273_v28, 16 }
 0x239   : > { %v1483_v25 = vsel %vm1840_vm0, 0, %v1839_v26  ;;  %v1297_v43 = vmul.u32 %v1293_v39, %v1269_v23  ;;  %vm1302_vm15 = vc.u32 %v1294_v32, %v1298_v62  ;;  %v1300_v55 = vshll.u32 %v1296_v6, 16 }
 0x23a   : > { %v1658_v22 = vmul.f32 -0.001358992, %v1657_v31  ;;  %v1665_v1 = vmul.f32 -0.00019511016, %v1657_v31  ;;  %v1484_v53 = vsub.s32 32, %v1483_v25  ;;  %v1488_v35 = vsub.s32 4294967266, %v1483_v25 }
 0x23b   : > { %v1288_v42 = vadd.s32 %v1287_v16, %v1277_v34  ;;  %v1303_v14 = vsel %vm1302_vm15, 1, %v1999_v0  ;;  %v1304_v11 = vadd.s32 %v1298_v62, %v1294_v32  ;;  %vm2914_vm2 = vcmp.le.f32.partialorder %v1374_v18, 0.7853982 }
 0x23c   : > { %v1659_v60 = vadd.f32 0.041655596, %v1658_v22  ;;  %v1666_v41 = vadd.f32 0.008332121, %v1665_v1  ;;  %v1486_v50 = vshrl.u32 %v1468_v33, %v1484_v53  ;;  %v1305_v4 = vadd.s32 %v1303_v14, %v1297_v43 }
 0x23d   : > { %v1485_v23 = vshll.u32 %v2873_v19, %v1483_v25  ;;  %v1489_v28 = vadd.s32 127, %v1488_v35  ;;  %v1279_v39 = vshrl.u32 %v2871_v56, 16  ;;  %vm1306_vm3 = vc.u32 %v1304_v11, %v1300_v55 }
 0x23e   : > { %v1660_v12 = vmul.f32 %v1659_v60, %v1657_v31  ;;  %v1667_v15 = vmul.f32 %v1666_v41, %v1657_v31  ;;  %v1299_v2 = vshrl.u32 %v1295_v40, 16  ;;  %v1307_v21 = vsel %vm1306_vm3, 1, %v1999_v0 }
 0x23f   : > { %vm1676_vm4 = vcmp.eq.s32.totalorder %v2898_v45, 0  ;;  %v1487_v36 = vor.u32 %v1486_v50, %v1485_v23  ;;  %v1490_v52 = vshll.u32 %v1489_v28, 23  ;;  %v2922_v7 = vadd.s32 %v1288_v42, %v1279_v39 }
 0x240   : > { %v1661_v37 = vadd.f32 -0.4999988, %v1660_v12  ;;  %v1668_v47 = vadd.f32 -0.16666654, %v1667_v15  ;;  %v1309_v18 = vadd.s32 %v1307_v21, %v1305_v4  ;;  %vm1675_vm5 = vcmp.lt.s32.totalorder %v2898_v45, 2 }
 0x241   : > { %vm1679_vm6 = vcmp.eq.s32.totalorder %v2898_v45, 2  ;;  %v1064_v56 = vand.u32 2147483647, %v2619_v3  ;;  %vm1672_vm7 = vweird.f32 %v2628_v24  ;;  %v1491_v19 = vor.u32 4788187, %v1490_v52 }
 0x242   : > { %v1662_v49 = vmul.f32 %v1661_v37, %v1657_v31  ;;  %v1669_v38 = vmul.f32 %v1668_v47, %v1657_v31  ;;  %v1301_v40 = vshrl.u32 %v1296_v6, 16  ;;  %v2928_v61 = vadd.s32 %v1304_v11, %v1300_v55 }
 0x243   : > { %v1310_v33 = vadd.s32 %v1309_v18, %v1299_v2  ;;  %v1499_v16 = vsel %vm1376_vm1, %v1498_v48, %v2856_v27  ;;  %v1312_v31 = vmul.u32 %v2850_v20, %v2907_v30  ;;  %v1492_v32 = vand.u32 2147483647, %v1491_v19 }
 0x244   : > { %v1663_v26 = vadd.f32 1.0, %v1662_v49  ;;  %v1670_v13 = vadd.f32 1.0, %v1669_v38  ;;  %v1494_v62 = vcvt.s32.f32 %v1487_v36  ;;  %vm1314_vm8 = vc.u32 %v2922_v7, %v2928_v61 }
 0x245   : > { %v1311_v22 = vadd.s32 %v1310_v33, %v1301_v40  ;;  %v1071_v25 = vand.u32 8388607, %v1064_v56  ;;  %v1085_v34 = vshrl.u32 %v2005_v5, %v2642_v9  ;;  %v1082_v20 = vshrl.u32 %v2004_v59, %v2642_v9 }
 0x246   : > { %v1671_v6 = vmul.f32 %v1670_v13, %v2896_v51  ;;  %v1680_v1 = vxor.u32 2147483648, %v1663_v26  ;;  %v1495_v43 = vmul.f32 %v1494_v62, %v1492_v32  ;;  %v1084_v30 = vshll.u32 %v2004_v59, %v2634_v58 }
 0x247   : > { %v1315_v27 = vadd.s32 1, %v1311_v22  ;;  %v1501_v60 = vsel %vm2914_vm2, 0, %v1499_v16  ;;  %v1087_v51 = vshll.u32 %v2005_v5, %v2634_v58  ;;  %v1088_v41 = vshrl.u32 %v2000_v46, %v2642_v9 }
 0x248   : > { %v1677_v48 = vxor.u32 2147483648, %v1671_v6  ;;  %v1496_v53 = vxor.u32 2147483648, %v1495_v43  ;;  %v1081_v35 = vshll.u32 %v2003_v57, %v2634_v58  ;;  %v2954_v42 = vor.u32 %v1085_v34, %v1084_v30 }
 0x249   : > { %v1316_v55 = vsel %vm1314_vm8, %v1315_v27, %v1311_v22  ;;  %v1681_v14 = vsel %vm1679_vm6, %v1680_v1, %v1671_v6  ;;  %v2960_v12 = vor.u32 %v1088_v41, %v1087_v51  ;;  %v1072_v15 = vor.u32 8388608, %v1071_v25 }
 0x24a   : > { %v1678_v59 = vsel %vm1676_vm4, %v1663_v26, %v1677_v48  ;;  %v1317_v11 = vadd.s32 %v1316_v55, %v1312_v31  ;;  %v1497_v46 = vsel %vm1376_vm1, %v1496_v53, %v1495_v43  ;;  %v2966_v50 = vor.u32 %v1082_v20, %v1081_v35 }
 0x24b   : > { %v1682_v5 = vsel %vm1675_vm5, %v1678_v59, %v1681_v14  ;;  %v1500_v4 = vsel %vm2914_vm2, %v2622_v10, %v1497_v46  ;;  %vm1096_vm9 = vcmp.lt.s32.totalorder %v2644_v54, 1  ;;  %v1105_v45 = vsel %vm1099_vm11, %v2865_v63, 920167782 }
 0x24c   : > { %v1683_v58 = vsel %vm1672_vm7, nan, %v1682_v5  ;;  %v1318_v23 = vadd.s32 536870912, %v1317_v11  ;;  %v1502_v28 = vmul.f32 %v1500_v4, %v1500_v4  ;;  %vm1098_vm12 = vcmp.lt.s32.totalorder %v2644_v54, 3 }
 0x24d   : > { %1706 = vmatpush.msrb.mxu2 %v1683_v58  ;;  %v1108_v24 = vsel %vm1096_vm9, %v2954_v42, %v2960_v12  ;;  %v1518_v39 = vadd.s32 3, %v1501_v60  ;;  %vm1097_vm14 = vcmp.lt.s32.totalorder %v2644_v54, 2  ;;  %v1110_v29 = vsel %vm1098_vm12, %v2865_v63, %v2891_v8 }
 0x24e   : > { %v2982_v37 = vshrl.u32 %v1318_v23, 30  ;;  %v1503_v47 = vmul.f32 -0.001358992, %v1502_v28  ;;  %v1510_v2 = vmul.f32 -0.00019511016, %v1502_v28  ;;  %v1111_v21 = vsel %vm1097_vm14, %v1108_v24, %v1110_v29 }
 0x24f   : > { %v2991_v36 = vshll.u32 %v1072_v15, 8  ;;  %v1104_v18 = vsel %vm1096_vm9, %v2966_v50, %v2954_v42  ;;  %v1106_v49 = vsel %vm1098_vm12, %v2960_v12, %v1105_v45  ;;  %v1116_v38 = vshrl.u32 %v1111_v21, 16 }
 0x250   : > { %v1320_v52 = vshll.u32 %v2982_v37, 30  ;;  %v1504_v63 = vadd.f32 0.041655596, %v1503_v47  ;;  %v1511_v8 = vadd.f32 0.008332121, %v1510_v2  ;;  %v1115_v33 = vand.u32 65535, %v1111_v21 }
 0x251   : > { %v1113_v40 = vand.u32 65535, %v2991_v36  ;;  %v1519_v16 = vand.u32 3, %v1518_v39  ;;  %v1107_v31 = vsel %vm1097_vm14, %v1104_v18, %v1106_v49  ;;  %v1114_v62 = vshrl.u32 %v2991_v36, 16 }
 0x252   : > { %v3001_v19 = vsub.s32 %v1317_v11, %v1320_v52  ;;  %v1505_v26 = vmul.f32 %v1504_v63, %v1502_v28  ;;  %v1512_v13 = vmul.f32 %v1511_v8, %v1502_v28  ;;  %v1138_v27 = vshrl.u32 %v1107_v31, 16 }
 0x253   : > { %v1118_v22 = vmul.u32 %v1116_v38, %v1113_v40  ;;  %v3010_v34 = vmul.u32 %v1115_v33, %v1114_v62  ;;  %v1117_v60 = vmul.u32 %v1115_v33, %v1113_v40  ;;  %vm1517_vm0 = vweird.f32 %v2622_v10 }
 0x254   : > { %vm1322_vm13 = vcmp.lt.s32.totalorder %v3001_v19, 0  ;;  %v1323_v32 = vsub.s32 0, %v3001_v19  ;;  %v1506_v6 = vadd.f32 -0.4999988, %v1505_v26  ;;  %v1513_v1 = vadd.f32 -0.16666654, %v1512_v13 }
 0x255   : > { %v1121_v43 = vshll.u32 %v1118_v22, 16  ;;  %vm1520_vm1 = vcmp.lt.s32.totalorder %v1519_v16, 2  ;;  %vm1521_vm15 = vcmp.eq.s32.totalorder %v1519_v16, 0  ;;  %v1120_v51 = vmul.u32 %v1116_v38, %v1114_v62 }
 0x256   : > { %v1324_v25 = vsel %vm1322_vm13, %v1323_v32, %v3001_v19  ;;  %v1507_v20 = vmul.f32 %v1506_v6, %v1502_v28  ;;  %v1514_v30 = vmul.f32 %v1513_v1, %v1502_v28  ;;  %v1137_v41 = vand.u32 65535, %v1107_v31 }
 0x257   : > { %v1325_v48 = vclz %v1324_v25  ;;  %vm1125_vm2 = vc.u32 %v1117_v60, %v1121_v43  ;;  %v1123_v59 = vshll.u32 %v3010_v34, 16  ;;  %v1127_v11 = vadd.s32 %v1121_v43, %v1117_v60 }
 0x258   : > { %v1508_v53 = vadd.f32 1.0, %v1507_v20  ;;  %v1515_v55 = vadd.f32 1.0, %v1514_v30  ;;  %v1126_v14 = vsel %vm1125_vm2, 1, %v1999_v0  ;;  %v1140_v5 = vmul.u32 %v1138_v27, %v1113_v40 }
 0x259   : > { %v1836_v35 = vadd.s32 4294967294, %v1325_v48  ;;  %v1128_v58 = vadd.s32 %v1126_v14, %v1120_v51  ;;  %vm1524_vm4 = vcmp.eq.s32.totalorder %v1519_v16, 2  ;;  %v1313_v23 = vadd.s32 %v2928_v61, %v2922_v7 }
 0x25a   : > { %v1516_v46 = vmul.f32 %v1515_v55, %v1500_v4  ;;  %v1525_v15 = vxor.u32 2147483648, %v1508_v53  ;;  %vm1129_vm5 = vc.u32 %v1127_v11, %v1123_v59  ;;  %v1139_v39 = vmul.u32 %v1137_v41, %v1113_v40 }
 0x25b   : > { %vm1837_vm3 = vcmp.lt.s32.totalorder %v1836_v35, 0  ;;  %v1141_v29 = vmul.u32 %v1137_v41, %v1114_v62  ;;  %v1130_v2 = vsel %vm1129_vm5, 1, %v1999_v0  ;;  %v1142_v21 = vmul.u32 %v1138_v27, %v1114_v62 }
 0x25c   : > { %v1328_v45 = vsel %vm1837_vm3, 0, %v1836_v35  ;;  %v1522_v28 = vxor.u32 2147483648, %v1516_v46  ;;  %v1143_v52 = vshll.u32 %v1140_v5, 16  ;;  %v1526_v18 = vsel %vm1524_vm4, %v1525_v15, %v1516_v46 }
 0x25d   : > { %v1329_v24 = vsub.s32 32, %v1328_v45  ;;  %v1333_v47 = vsub.s32 4294967266, %v1328_v45  ;;  %v1132_v38 = vadd.s32 %v1130_v2, %v1128_v58  ;;  %v1330_v7 = vshll.u32 %v3001_v19, %v1328_v45 }
 0x25e   : > { %v1523_v4 = vsel %vm1521_vm15, %v1508_v53, %v1522_v28  ;;  %vm1147_vm6 = vc.u32 %v1139_v39, %v1143_v52  ;;  %v1122_v40 = vshrl.u32 %v1118_v22, 16  ;;  %v1145_v33 = vshll.u32 %v1141_v29, 16 }
 0x25f   : > { %v1331_v49 = vshrl.u32 %v1313_v23, %v1329_v24  ;;  %v1527_v63 = vsel %vm1520_vm1, %v1523_v4, %v1526_v18  ;;  %v1334_v61 = vadd.s32 127, %v1333_v47  ;;  %v1148_v26 = vsel %vm1147_vm6, 1, %v1999_v0 }
 0x260   : > { %v1528_v8 = vsel %vm1517_vm0, nan, %v1527_v63  ;;  %v1149_v32 = vadd.s32 %v1143_v52, %v1139_v39  ;;  %v1150_v62 = vadd.s32 %v1148_v26, %v1142_v21  ;;  %v1133_v6 = vadd.s32 %v1132_v38, %v1122_v40 }
 0x261   : > { %1707 = vmatpush.msrb.mxu2 %v1528_v8  ;;  %v1332_v13 = vor.u32 %v1331_v49, %v1330_v7  ;;  %v1335_v31 = vshll.u32 %v1334_v61, 23  ;;  %v1101_v19 = vsel %vm1099_vm11, %v2960_v12, 2102212464  ;;  %v1080_v10 = vshrl.u32 %v2003_v57, %v2642_v9 }
 0x262   : > { %vm1151_vm7 = vc.u32 %v1149_v32, %v1145_v33  ;;  %v1124_v16 = vshrl.u32 %v3010_v34, 16  ;;  %v1144_v27 = vshrl.u32 %v1140_v5, 16  ;;  %v1102_v12 = vsel %vm1098_vm12, %v2954_v42, %v1101_v19 }
 0x263   : > { %v1336_v1 = vor.u32 4788187, %v1335_v31  ;;  %v1152_v22 = vsel %vm1151_vm7, 1, %v1999_v0  ;;  %v1339_v43 = vcvt.s32.f32 %v1332_v13  ;;  %v1100_v30 = vsel %vm1096_vm9, %v1080_v10, %v2966_v50 }
 0x264   : > { %v1154_v20 = vadd.s32 %v1152_v22, %v1150_v62  ;;  %v1134_v48 = vadd.s32 %v1133_v6, %v1124_v16  ;;  %v1146_v51 = vshrl.u32 %v1141_v29, 16  ;;  %v1153_v9 = vadd.s32 %v1149_v32, %v1145_v33 }
 0x265   : > { %v1337_v25 = vand.u32 2147483647, %v1336_v1  ;;  %v1103_v0 = vsel %vm1097_vm14, %v1100_v30, %v1102_v12  ;;  %vm1221_vm11 = vcmp.lt.s32.totalorder %v2625_v17, 0  ;;  %vm3042_vm9 = vcmp.le.f32.partialorder %v1219_v44, 0.7853982 }
 0x266   : > { %v1155_v57 = vadd.s32 %v1154_v20, %v1144_v27  ;;  %vm1159_vm8 = vc.u32 %v1134_v48, %v1153_v9  ;;  %v1343_v55 = vsub.s32 4, %v2982_v37  ;;  %v1157_v54 = vmul.u32 %v2991_v36, %v1103_v0 }
 0x267   : > { %v1340_v60 = vmul.f32 %v1339_v43, %v1337_v25  ;;  %vm1362_vm15 = vweird.f32 %v2625_v17  ;;  %v1158_v6 = vadd.s32 %v1153_v9, %v1134_v48  ;;  %vm1066_vm2 = vcmp.lt.s32.totalorder %v2619_v3, 0 }
 0x268   : > { %v1156_v41 = vadd.s32 %v1155_v57, %v1146_v51  ;;  %v1344_v44 = vsel %vm1221_vm11, %v1343_v55, %v2982_v37  ;;  %vm1065_vm3 = vcmp.le.f32.partialorder %v1064_v56, 0.7853982  ;;  %vm1207_vm7 = vweird.f32 %v2619_v3 }
 0x269   : > { %v1341_v34 = vxor.u32 2147483648, %v1340_v60  ;;  %v1346_v28 = vsel %vm3042_vm9, 0, %v1344_v44 }
 0x26a   : > { %v1160_v53 = vadd.s32 1, %v1156_v41  ;;  %v1363_v36 = vadd.s32 3, %v1346_v28 }
 0x26b   : > { %v1342_v42 = vsel %vm1221_vm11, %v1341_v34, %v1340_v60  ;;  %vm1714_vm11 = vcmask 125952  }
 0x26c   : > { %v1345_v35 = vsel %vm3042_vm9, %v2625_v17, %v1342_v42  ;;  %v1161_v14 = vsel %vm1159_vm8, %v1160_v53, %v1156_v41  ;;  %v1364_v38 = vand.u32 3, %v1363_v36 }
 0x26d   : > { %v1347_v59 = vmul.f32 %v1345_v35, %v1345_v35  ;;  %v1162_v11 = vadd.s32 %v1161_v14, %v1157_v54 }
 0x26e   : > { %vm1366_vm14 = vcmp.eq.s32.totalorder %v1364_v38, 0  ;;  %vm1369_vm13 = vcmp.eq.s32.totalorder %v1364_v38, 2  ;;  %vm1365_vm0 = vcmp.lt.s32.totalorder %v1364_v38, 2 }
 0x26f   : > { %v1348_v5 = vmul.f32 -0.001358992, %v1347_v59  ;;  %v1355_v46 = vmul.f32 -0.00019511016, %v1347_v59  ;;  %v1163_v15 = vadd.s32 536870912, %v1162_v11 }
 0x271   : > { %v1349_v58 = vadd.f32 0.041655596, %v1348_v5  ;;  %v1356_v23 = vadd.f32 0.008332121, %v1355_v46  ;;  %v1164_v45 = vshrl.u32 %v1163_v15, 30 }
 0x273   : > { %v1350_v24 = vmul.f32 %v1349_v58, %v1347_v59  ;;  %v1357_v39 = vmul.f32 %v1356_v23, %v1347_v59  ;;  %v1165_v29 = vshll.u32 %v1164_v45, 30  ;;  %v1188_v48 = vsub.s32 4, %v1164_v45 }
 0x275   : > { %v1351_v47 = vadd.f32 -0.4999988, %v1350_v24  ;;  %v1358_v2 = vadd.f32 -0.16666654, %v1357_v39  ;;  %v1166_v21 = vsub.s32 %v1162_v11, %v1165_v29  ;;  %v1189_v0 = vsel %vm1066_vm2, %v1188_v48, %v1164_v45  ;;  %v1684_v24 = vld [vmem:[%s3106_s5] sm:$0xf] }
 0x276   : > { %v1191_v42 = vsel %vm1065_vm3, 0, %v1189_v0 }
 0x277   : > { %v1352_v52 = vmul.f32 %v1351_v47, %v1347_v59  ;;  %v1359_v4 = vmul.f32 %v1358_v2, %v1347_v59  ;;  %vm1167_vm12 = vcmp.lt.s32.totalorder %v1166_v21, 0  ;;  %v1168_v18 = vsub.s32 0, %v1166_v21 }
 0x278   : > { %v1208_v59 = vadd.s32 3, %v1191_v42 }
 0x279   : > { %v1353_v49 = vadd.f32 1.0, %v1352_v52  ;;  %v1360_v37 = vadd.f32 1.0, %v1359_v4  ;;  %v1169_v63 = vsel %vm1167_vm12, %v1168_v18, %v1166_v21 }
 0x27a   : > { %v1170_v8 = vclz %v1169_v63  ;;  %v1209_v46 = vand.u32 3, %v1208_v59 }
 0x27b   : > { %v1361_v7 = vmul.f32 %v1360_v37, %v1345_v35  ;;  %v1370_v61 = vxor.u32 2147483648, %v1353_v49 }
 0x27c   : > { %v1833_v33 = vadd.s32 4294967294, %v1170_v8  ;;  %vm1211_vm4 = vcmp.eq.s32.totalorder %v1209_v46, 0  ;;  %vm1214_vm5 = vcmp.eq.s32.totalorder %v1209_v46, 2  ;;  %vm1210_vm6 = vcmp.lt.s32.totalorder %v1209_v46, 2 }
 0x27d   : > { %v1367_v40 = vxor.u32 2147483648, %v1361_v7  ;;  %v1371_v13 = vsel %vm1369_vm13, %v1370_v61, %v1361_v7 }
 0x27e   : > { %vm1834_vm1 = vcmp.lt.s32.totalorder %v1833_v33, 0 }
 0x27f   : > { %v1368_v26 = vsel %vm1366_vm14, %v1353_v49, %v1367_v40  ;;  %v1173_v32 = vsel %vm1834_vm1, 0, %v1833_v33 }
 0x280   : > { %v1372_v31 = vsel %vm1365_vm0, %v1368_v26, %v1371_v13  ;;  %v1174_v1 = vsub.s32 32, %v1173_v32  ;;  %v1178_v19 = vsub.s32 4294967266, %v1173_v32  ;;  %v1175_v10 = vshll.u32 %v1166_v21, %v1173_v32 }
 0x281   : > { %v1373_v62 = vsel %vm1362_vm15, nan, %v1372_v31 }
 0x282   : > { %1708 = vmatpush.msrb.mxu2 %v1373_v62  ;;  %v1176_v16 = vshrl.u32 %v1158_v6, %v1174_v1  ;;  %v1179_v22 = vadd.s32 127, %v1178_v19 }
 0x284   : > { %v1177_v25 = vor.u32 %v1176_v16, %v1175_v10  ;;  %v1180_v43 = vshll.u32 %v1179_v22, 23 }
 0x286   : > { %v1181_v27 = vor.u32 4788187, %v1180_v43  ;;  %v1184_v30 = vcvt.s32.f32 %v1177_v25 }
 0x288   : > { %v1182_v20 = vand.u32 2147483647, %v1181_v27 }
 0x28a   : > { %v1185_v12 = vmul.f32 %v1184_v30, %v1182_v20 }
 0x28c   : > { %v1186_v60 = vxor.u32 2147483648, %v1185_v12 }
 0x28e   : > { %v1187_v17 = vsel %vm1066_vm2, %v1186_v60, %v1185_v12 }
 0x28f   : > { %v1190_v51 = vsel %vm1065_vm3, %v2619_v3, %v1187_v17  ;;  %v1689_v3 = vpop.permute.xlu2 %1688 }
 0x290   : > { %v1192_v57 = vmul.f32 %v1190_v51, %v1190_v51 }
 0x292   : > { %v1193_v9 = vmul.f32 -0.001358992, %v1192_v57  ;;  %v1200_v34 = vmul.f32 -0.00019511016, %v1192_v57 }
 0x294   : > { %v1194_v41 = vadd.f32 0.041655596, %v1193_v9  ;;  %v1201_v50 = vadd.f32 0.008332121, %v1200_v34 }
 0x296   : > { %v1195_v53 = vmul.f32 %v1194_v41, %v1192_v57  ;;  %v1202_v55 = vmul.f32 %v1201_v50, %v1192_v57 }
 0x298   : > { %v1196_v35 = vadd.f32 -0.4999988, %v1195_v53  ;;  %v1203_v54 = vadd.f32 -0.16666654, %v1202_v55 }
 0x29a   : > { %v1197_v14 = vmul.f32 %v1196_v35, %v1192_v57  ;;  %v1204_v11 = vmul.f32 %v1203_v54, %v1192_v57 }
 0x29c   : > { %v1198_v5 = vadd.f32 1.0, %v1197_v14  ;;  %v1205_v56 = vadd.f32 1.0, %v1204_v11 }
 0x29e   : > { %v1206_v44 = vmul.f32 %v1205_v56, %v1190_v51  ;;  %v1215_v15 = vxor.u32 2147483648, %v1198_v5 }
 0x2a0   : > { %v1212_v58 = vxor.u32 2147483648, %v1206_v44  ;;  %v1216_v45 = vsel %vm1214_vm5, %v1215_v15, %v1206_v44 }
 0x2a2   : > { %v1213_v23 = vsel %vm1211_vm4, %v1198_v5, %v1212_v58 }
 0x2a3   : > { %v1217_v28 = vsel %vm1210_vm6, %v1213_v23, %v1216_v45 }
 0x2a4   : > { %v1218_v39 = vsel %vm1207_vm7, nan, %v1217_v28 }
 0x2a5   : > { %1709 = vmatpush.msrb.mxu2 %v1218_v39 }
 0x2a6   : > { %1844 = vmatmul.msk.f32.vlgmr.msrb.gmra.mxu2 %vm1022_vm10, %v1684_v24 }
 0x329   : > { %v1711_v29 = vpop.f32.mrf.mxu2 }
 0x32a   : > { %v1712_v47 = vadd.f32 %v1711_v29, %v1689_v3 }
 0x32c   : > { %1715 = vst.msk [vmem:[%s291_s23] sm:$0xf] %vm1714_vm11, %v1712_v47 }
 0x32d   : > { %1946 = shalt.err (!%p1943_p5)
}
 0x32e   : > { %1854 = dma.vmem_to_hbm [thread:$0]  (%p2086_p4), %s1731_s30, 64, %s1733_s8, %s1717_s10  }
 0x32f PF: > { %p1860_p6 = scmp.ge.s32.totalorder %s1997_s29, 2  ;;  %s1744_s17 = sand.u32 1, %s1977_s24  }
 0x330   : > { %s1745_s21 = scalar_lea.sflag [#allocation3], %s1744_s17 }
 0x331   : > { %p1857_p7 = pnand %p1860_p6, %p2093_p8 }
 0x333   : > { %p1858_p9 = pneg %p1857_p7 }
 0x335   : > { %1972 = dma.done.wait (%p1858_p9), %s1745_s21, 64  }
 0x336   : > { %1974 = vsyncadd (%p1858_p9), %s1745_s21, 4294967232  ;;  %s20_s29 = sadd.s32 1, %s1997_s29   ;;  %s3125_s24 = smov %s1981_s25 }
 0x337   : > { %p17_p10 = scmp.ge.s32.totalorder %s20_s29, 4   ;;  %s3126_s25 = smov %s1985_s26 }
 0x338   : > { %s3127_s26 = smov %s2099_s14  ;;  %s3128_s27 = smov %s1993_s28 }
 0x339   : > { %s3129_s28 = smov %s3131_s9  ;;  %19 = sbr.rel (!%p17_p10) target bundleno = 4 (0x4), region = 83 }
 0x33e   :  { %1751 = vsyncpa [#allocation3], 1 }
 0x33f   :  { %1753 = vsyncpa [#allocation3 + $0x1], 1 }

</bundles_post_ra>
